<compile_context>
chip_gen: v5e
topology: v5e:2x2
jax: 0.10.0
libtpu: 0.0.40
codegen_flags: <defaults>
</compile_context>

<pallas_src>
import functools

import jax
import jax.numpy as jnp
import numpy as np
from jax.experimental import pallas as pl
from jax.experimental.pallas import tpu as pltpu


def _ceil128(n):
    return ((n + 127) // 128) * 128


def recurrent_net_kernel(
    x_ref,     # (T*B, Din)  time-major flattened input
    wfc_ref,   # (Din, Dfc)
    wi_ref,    # (Dfc, 3G)   fused input->gate weights, gate g at lanes [g*G, g*G+H)
    wh_ref,    # (H,   3G)   fused hidden->gate weights, same lane layout
    wt_ref,    # (H, Pout)   tail weights, lane-padded to a multiple of 128
    b_ref,     # (4, Wb)     packed biases: rows = [b_fc, b_gates_in, b_gates_hid, b_tail]
    out_ref,   # (B, Pout)
    *, B, T, H, G,
):
    Dfc = wfc_ref.shape[1]
    Pout = wt_ref.shape[1]

    # ---- fc_model: Linear + ReLU over all (batch, timestep) rows at once ----
    fc = jnp.maximum(
        jnp.dot(x_ref[...], wfc_ref[...], preferred_element_type=jnp.float32)
        + b_ref[0:1, 0:Dfc],
        0.0,
    )                                                            # (T*B, Dfc)

    # ---- input-side gate projections for ALL timesteps in one matmul ----
    # lanes [0,H)       : W_ir x + b_r   (b_r = b_ir + b_hr)
    # lanes [G,G+H)     : W_iz x + b_z   (b_z = b_iz + b_hz)
    # lanes [2G,2G+H)   : W_in x + b_in
    gx = (
        jnp.dot(fc, wi_ref[...], preferred_element_type=jnp.float32)
        + b_ref[1:2, 0:3 * G]
    )                                                            # (T*B, 3G)
    # Lane-aligned gate blocks: full-vreg slices, no cross-lane rotations.
    gx_r = gx[:, 0:G]
    gx_z = gx[:, G:2 * G]
    gx_n = gx[:, 2 * G:3 * G]

    w_h = wh_ref[...]                                            # (H, 3G), loaded once
    # Hoist the hidden-side bias broadcast (only b_hn is non-zero, in the n-block).
    bh_b = jnp.broadcast_to(b_ref[2:3, 0:3 * G], (B, 3 * G))

    # ---- GRU recurrence (PyTorch gate order r, z, n), fully unrolled ----
    # Hidden state kept lane-padded to G; pad lanes provably stay exactly 0.
    h = jnp.zeros((B, G), jnp.float32)
    for t in range(T):       # T static & small -> full unroll, static slices
        lo = t * B
        hh = jnp.dot(h[:, 0:H], w_h, preferred_element_type=jnp.float32) + bh_b
        r = jax.nn.sigmoid(gx_r[lo:lo + B, :] + hh[:, 0:G])
        z = jax.nn.sigmoid(gx_z[lo:lo + B, :] + hh[:, G:2 * G])
        n = jnp.tanh(gx_n[lo:lo + B, :] + r * hh[:, 2 * G:3 * G])
        h = (1.0 - z) * n + z * h

    # ---- model_tail: Linear(H -> out_dim), lane-dense (padded) store ----
    out_ref[...] = (
        jnp.dot(h[:, 0:H], wt_ref[...], preferred_element_type=jnp.float32)
        + b_ref[3:4, 0:Pout]
    )


def recurrent_net_forward(x, params):
    B, T, Din = x.shape
    Dfc = params["w_fc"].shape[1]
    H = params["w_hr"].shape[0]
    out_dim = params["w_tail"].shape[1]

    G = _ceil128(H)            # per-gate 128-aligned lane block
    Pout = _ceil128(out_dim)   # lane-dense output width
    Wb = max(3 * G, _ceil128(Dfc), Pout)
    f32 = jnp.float32

    # Time-major flatten in the wrapper (cheap XLA transpose), so the kernel
    # slices each timestep as contiguous rows.
    x2d = jnp.transpose(x, (1, 0, 2)).reshape(T * B, Din)

    # Host-side fusion of gate weights into lane-ALIGNED blocks [r | z | n]:
    # gate g occupies lanes [g*G, g*G + H); everything else is zero.
    w_i = jnp.zeros((Dfc, 3 * G), f32)
    w_i = (w_i.at[:, 0:H].set(params["w_ir"])
              .at[:, G:G + H].set(params["w_iz"])
              .at[:, 2 * G:2 * G + H].set(params["w_in"]))
    w_h = jnp.zeros((H, 3 * G), f32)
    w_h = (w_h.at[:, 0:H].set(params["w_hr"])
              .at[:, G:G + H].set(params["w_hz"])
              .at[:, 2 * G:2 * G + H].set(params["w_hn"]))
    w_t = jnp.zeros((H, Pout), f32).at[:, 0:out_dim].set(params["w_tail"])

    # All biases packed into one (4, Wb) array -> one DMA instead of four.
    b = jnp.zeros((4, Wb), f32)
    b = (b.at[0, 0:Dfc].set(params["b_fc"][0])
          .at[1, 0:H].set(params["b_r"][0])
          .at[1, G:G + H].set(params["b_z"][0])
          .at[1, 2 * G:2 * G + H].set(params["b_in"][0])
          .at[2, 2 * G:2 * G + H].set(params["b_hn"][0])
          .at[3, 0:out_dim].set(params["b_tail"][0]))

    args = (x2d, params["w_fc"], w_i, w_h, w_t, b)
    vmem = pl.BlockSpec(memory_space=pltpu.MemorySpace.VMEM)
    kernel = functools.partial(recurrent_net_kernel, B=B, T=T, H=H, G=G)
    out_padded = pl.pallas_call(
        kernel,
        out_shape=jax.ShapeDtypeStruct((B, Pout), f32),
        in_specs=[vmem] * len(args),
        out_specs=vmem,
    )(*args)
    return out_padded[:, :out_dim]


def init_params(key, in_dim, fc_dim, hidden, out_dim):
    """Deterministic xavier-uniform-style init (synthetic, no checkpoint load)."""
    ks = jax.random.split(key, 16)

    def xavier(k, shape):
        fan_in, fan_out = shape
        bound = float(np.sqrt(6.0 / (fan_in + fan_out)))
        return jax.random.uniform(k, shape, jnp.float32, -bound, bound)

    def bias(k, n):
        return jax.random.uniform(k, (1, n), jnp.float32, -0.05, 0.05)

    return dict(
        # fc_model
        w_fc=xavier(ks[0], (in_dim, fc_dim)),
        b_fc=bias(ks[1], fc_dim),
        # GRU input-to-hidden (transposed), gate order r, z, n
        w_ir=xavier(ks[2], (fc_dim, hidden)),
        w_iz=xavier(ks[3], (fc_dim, hidden)),
        w_in=xavier(ks[4], (fc_dim, hidden)),
        # GRU hidden-to-hidden (transposed)
        w_hr=xavier(ks[5], (hidden, hidden)),
        w_hz=xavier(ks[6], (hidden, hidden)),
        w_hn=xavier(ks[7], (hidden, hidden)),
        # biases: b_r = b_ir + b_hr, b_z = b_iz + b_hz (fused);
        # b_in and b_hn stay separate (b_hn is gated by r).
        b_r=bias(ks[8], hidden),
        b_z=bias(ks[9], hidden),
        b_in=bias(ks[10], hidden),
        b_hn=bias(ks[11], hidden),
        # model_tail
        w_tail=xavier(ks[12], (hidden, out_dim)),
        b_tail=bias(ks[13], out_dim),
    )


def reference_forward(x, p):
    """Plain-JAX reference mirroring the PyTorch forward semantics."""
    B, T, Din = x.shape
    h = jnp.zeros((B, p["w_hr"].shape[0]), jnp.float32)
    fc = jnp.maximum(x.reshape(B * T, Din) @ p["w_fc"] + p["b_fc"], 0.0)
    fc = fc.reshape(B, T, -1)
    for t in range(T):
        x_t = fc[:, t, :]
        r = jax.nn.sigmoid(x_t @ p["w_ir"] + h @ p["w_hr"] + p["b_r"])
        z = jax.nn.sigmoid(x_t @ p["w_iz"] + h @ p["w_hz"] + p["b_z"])
        n = jnp.tanh(x_t @ p["w_in"] + p["b_in"] + r * (h @ p["w_hn"] + p["b_hn"]))
        h = (1.0 - z) * n + z * h
    return h @ p["w_tail"] + p["b_tail"]


if __name__ == "__main__":
    # Small shapes consistent with the net_spec: batch=2, seq_len=8, state_dim=4,
    # fc_hid_layers=[32], rnn_hidden_size=32, out_dim=4 (single tail).
    batch, seq_len, in_dim = 2, 8, 4
    fc_dim, hidden, out_dim = 32, 32, 4

    key = jax.random.PRNGKey(0)
    k_x, k_p = jax.random.split(key)
    x = jax.random.normal(k_x, (batch, seq_len, in_dim), jnp.float32)
    params = init_params(k_p, in_dim, fc_dim, hidden, out_dim)

    out = recurrent_net_forward(x, params)
    out = jax.block_until_ready(out)

    ref = reference_forward(x, params)
    np.testing.assert_allclose(np.asarray(out), np.asarray(ref), rtol=1e-4, atol=1e-5)

    print("KERNEL_OK")
</pallas_src>

<mosaic_0001>
module attributes {stable_mosaic.version = 11 : i64} {
  func.func @recurrent_net_kernel(%arg0: memref<16x4xf32, #tpu.memory_space<vmem>>, %arg1: memref<4x32xf32, #tpu.memory_space<vmem>>, %arg2: memref<32x384xf32, #tpu.memory_space<vmem>>, %arg3: memref<32x384xf32, #tpu.memory_space<vmem>>, %arg4: memref<32x128xf32, #tpu.memory_space<vmem>>, %arg5: memref<4x384xf32, #tpu.memory_space<vmem>>, %arg6: memref<2x128xf32, #tpu.memory_space<vmem>>) attributes {dimension_semantics = [], scalar_prefetch = 0 : i64, scratch_operands = 0 : i64, tpu.core_type = #tpu.core_type<tc>} {
    %c0 = arith.constant 0 : index
    %c0_0 = arith.constant 0 : index
    %0 = vector.load %arg0[%c0, %c0_0] : memref<16x4xf32, #tpu.memory_space<vmem>>, vector<16x4xf32>
    %c0_1 = arith.constant 0 : index
    %c0_2 = arith.constant 0 : index
    %1 = vector.load %arg1[%c0_1, %c0_2] : memref<4x32xf32, #tpu.memory_space<vmem>>, vector<4x32xf32>
    %cst = arith.constant dense<0.000000e+00> : vector<16x32xf32>
    %2 = tpu.matmul %0, %1, %cst {dimension_numbers = #tpu.dot_dimension_numbers<[1], [0], [0], [1], [0, 0, 1, 1], [], []>} : vector<16x4xf32>, vector<4x32xf32>, vector<16x32xf32> -> vector<16x32xf32>
    %c0_3 = arith.constant 0 : index
    %c0_4 = arith.constant 0 : index
    %3 = vector.load %arg5[%c0_3, %c0_4] : memref<4x384xf32, #tpu.memory_space<vmem>>, vector<1x32xf32>
    %4 = vector.broadcast %3 : vector<1x32xf32> to vector<16x32xf32>
    %5 = arith.addf %2, %4 : vector<16x32xf32>
    %cst_5 = arith.constant 0.000000e+00 : f32
    %6 = vector.broadcast %cst_5 : f32 to vector<16x32xf32>
    %7 = arith.maximumf %5, %6 : vector<16x32xf32>
    %c0_6 = arith.constant 0 : index
    %c0_7 = arith.constant 0 : index
    %8 = vector.load %arg2[%c0_6, %c0_7] : memref<32x384xf32, #tpu.memory_space<vmem>>, vector<32x384xf32>
    %cst_8 = arith.constant dense<0.000000e+00> : vector<16x384xf32>
    %9 = tpu.matmul %7, %8, %cst_8 {dimension_numbers = #tpu.dot_dimension_numbers<[1], [0], [0], [1], [0, 0, 1, 1], [], []>} : vector<16x32xf32>, vector<32x384xf32>, vector<16x384xf32> -> vector<16x384xf32>
    %c1 = arith.constant 1 : index
    %c0_9 = arith.constant 0 : index
    %10 = vector.load %arg5[%c1, %c0_9] : memref<4x384xf32, #tpu.memory_space<vmem>>, vector<1x384xf32>
    %11 = vector.broadcast %10 : vector<1x384xf32> to vector<16x384xf32>
    %12 = arith.addf %9, %11 : vector<16x384xf32>
    %13 = vector.extract_strided_slice %12 {offsets = [0, 0], sizes = [16, 128], strides = [1, 1]} : vector<16x384xf32> to vector<16x128xf32>
    %14 = vector.extract_strided_slice %12 {offsets = [0, 128], sizes = [16, 128], strides = [1, 1]} : vector<16x384xf32> to vector<16x128xf32>
    %15 = vector.extract_strided_slice %12 {offsets = [0, 256], sizes = [16, 128], strides = [1, 1]} : vector<16x384xf32> to vector<16x128xf32>
    %c0_10 = arith.constant 0 : index
    %c0_11 = arith.constant 0 : index
    %16 = vector.load %arg3[%c0_10, %c0_11] : memref<32x384xf32, #tpu.memory_space<vmem>>, vector<32x384xf32>
    %c2 = arith.constant 2 : index
    %c0_12 = arith.constant 0 : index
    %17 = vector.load %arg5[%c2, %c0_12] : memref<4x384xf32, #tpu.memory_space<vmem>>, vector<1x384xf32>
    %18 = vector.shape_cast %17 : vector<1x384xf32> to vector<1x384xf32>
    %19 = vector.broadcast %18 : vector<1x384xf32> to vector<2x384xf32>
    %cst_13 = arith.constant 0.000000e+00 : f32
    %20 = vector.broadcast %cst_13 : f32 to vector<2x128xf32>
    %21 = vector.extract_strided_slice %20 {offsets = [0, 0], sizes = [2, 32], strides = [1, 1]} : vector<2x128xf32> to vector<2x32xf32>
    %cst_14 = arith.constant dense<0.000000e+00> : vector<2x384xf32>
    %22 = tpu.matmul %21, %16, %cst_14 {dimension_numbers = #tpu.dot_dimension_numbers<[1], [0], [0], [1], [0, 0, 1, 1], [], []>} : vector<2x32xf32>, vector<32x384xf32>, vector<2x384xf32> -> vector<2x384xf32>
    %23 = arith.addf %22, %19 : vector<2x384xf32>
    %24 = vector.extract_strided_slice %13 {offsets = [0, 0], sizes = [2, 128], strides = [1, 1]} : vector<16x128xf32> to vector<2x128xf32>
    %25 = vector.extract_strided_slice %23 {offsets = [0, 0], sizes = [2, 128], strides = [1, 1]} : vector<2x384xf32> to vector<2x128xf32>
    %26 = arith.addf %24, %25 : vector<2x128xf32>
    %27 = arith.negf %26 : vector<2x128xf32>
    %28 = math.exp %27 : vector<2x128xf32>
    %cst_15 = arith.constant 1.000000e+00 : f32
    %29 = vector.broadcast %cst_15 : f32 to vector<2x128xf32>
    %30 = arith.addf %29, %28 : vector<2x128xf32>
    %31 = arith.divf %29, %30 : vector<2x128xf32>
    %32 = vector.extract_strided_slice %14 {offsets = [0, 0], sizes = [2, 128], strides = [1, 1]} : vector<16x128xf32> to vector<2x128xf32>
    %33 = vector.extract_strided_slice %23 {offsets = [0, 128], sizes = [2, 128], strides = [1, 1]} : vector<2x384xf32> to vector<2x128xf32>
    %34 = arith.addf %32, %33 : vector<2x128xf32>
    %35 = arith.negf %34 : vector<2x128xf32>
    %36 = math.exp %35 : vector<2x128xf32>
    %cst_16 = arith.constant 1.000000e+00 : f32
    %37 = vector.broadcast %cst_16 : f32 to vector<2x128xf32>
    %38 = arith.addf %37, %36 : vector<2x128xf32>
    %39 = arith.divf %37, %38 : vector<2x128xf32>
    %40 = vector.extract_strided_slice %15 {offsets = [0, 0], sizes = [2, 128], strides = [1, 1]} : vector<16x128xf32> to vector<2x128xf32>
    %41 = vector.extract_strided_slice %23 {offsets = [0, 256], sizes = [2, 128], strides = [1, 1]} : vector<2x384xf32> to vector<2x128xf32>
    %42 = arith.mulf %31, %41 : vector<2x128xf32>
    %43 = arith.addf %40, %42 : vector<2x128xf32>
    %44 = math.tanh %43 : vector<2x128xf32>
    %cst_17 = arith.constant 1.000000e+00 : f32
    %45 = vector.broadcast %cst_17 : f32 to vector<2x128xf32>
    %46 = arith.subf %45, %39 : vector<2x128xf32>
    %47 = arith.mulf %46, %44 : vector<2x128xf32>
    %48 = arith.mulf %39, %20 : vector<2x128xf32>
    %49 = arith.addf %47, %48 : vector<2x128xf32>
    %50 = vector.extract_strided_slice %49 {offsets = [0, 0], sizes = [2, 32], strides = [1, 1]} : vector<2x128xf32> to vector<2x32xf32>
    %cst_18 = arith.constant dense<0.000000e+00> : vector<2x384xf32>
    %51 = tpu.matmul %50, %16, %cst_18 {dimension_numbers = #tpu.dot_dimension_numbers<[1], [0], [0], [1], [0, 0, 1, 1], [], []>} : vector<2x32xf32>, vector<32x384xf32>, vector<2x384xf32> -> vector<2x384xf32>
    %52 = arith.addf %51, %19 : vector<2x384xf32>
    %53 = vector.extract_strided_slice %13 {offsets = [2, 0], sizes = [2, 128], strides = [1, 1]} : vector<16x128xf32> to vector<2x128xf32>
    %54 = vector.extract_strided_slice %52 {offsets = [0, 0], sizes = [2, 128], strides = [1, 1]} : vector<2x384xf32> to vector<2x128xf32>
    %55 = arith.addf %53, %54 : vector<2x128xf32>
    %56 = arith.negf %55 : vector<2x128xf32>
    %57 = math.exp %56 : vector<2x128xf32>
    %cst_19 = arith.constant 1.000000e+00 : f32
    %58 = vector.broadcast %cst_19 : f32 to vector<2x128xf32>
    %59 = arith.addf %58, %57 : vector<2x128xf32>
    %60 = arith.divf %58, %59 : vector<2x128xf32>
    %61 = vector.extract_strided_slice %14 {offsets = [2, 0], sizes = [2, 128], strides = [1, 1]} : vector<16x128xf32> to vector<2x128xf32>
    %62 = vector.extract_strided_slice %52 {offsets = [0, 128], sizes = [2, 128], strides = [1, 1]} : vector<2x384xf32> to vector<2x128xf32>
    %63 = arith.addf %61, %62 : vector<2x128xf32>
    %64 = arith.negf %63 : vector<2x128xf32>
    %65 = math.exp %64 : vector<2x128xf32>
    %cst_20 = arith.constant 1.000000e+00 : f32
    %66 = vector.broadcast %cst_20 : f32 to vector<2x128xf32>
    %67 = arith.addf %66, %65 : vector<2x128xf32>
    %68 = arith.divf %66, %67 : vector<2x128xf32>
    %69 = vector.extract_strided_slice %15 {offsets = [2, 0], sizes = [2, 128], strides = [1, 1]} : vector<16x128xf32> to vector<2x128xf32>
    %70 = vector.extract_strided_slice %52 {offsets = [0, 256], sizes = [2, 128], strides = [1, 1]} : vector<2x384xf32> to vector<2x128xf32>
    %71 = arith.mulf %60, %70 : vector<2x128xf32>
    %72 = arith.addf %69, %71 : vector<2x128xf32>
    %73 = math.tanh %72 : vector<2x128xf32>
    %cst_21 = arith.constant 1.000000e+00 : f32
    %74 = vector.broadcast %cst_21 : f32 to vector<2x128xf32>
    %75 = arith.subf %74, %68 : vector<2x128xf32>
    %76 = arith.mulf %75, %73 : vector<2x128xf32>
    %77 = arith.mulf %68, %49 : vector<2x128xf32>
    %78 = arith.addf %76, %77 : vector<2x128xf32>
    %79 = vector.extract_strided_slice %78 {offsets = [0, 0], sizes = [2, 32], strides = [1, 1]} : vector<2x128xf32> to vector<2x32xf32>
    %cst_22 = arith.constant dense<0.000000e+00> : vector<2x384xf32>
    %80 = tpu.matmul %79, %16, %cst_22 {dimension_numbers = #tpu.dot_dimension_numbers<[1], [0], [0], [1], [0, 0, 1, 1], [], []>} : vector<2x32xf32>, vector<32x384xf32>, vector<2x384xf32> -> vector<2x384xf32>
    %81 = arith.addf %80, %19 : vector<2x384xf32>
    %82 = vector.extract_strided_slice %13 {offsets = [4, 0], sizes = [2, 128], strides = [1, 1]} : vector<16x128xf32> to vector<2x128xf32>
    %83 = vector.extract_strided_slice %81 {offsets = [0, 0], sizes = [2, 128], strides = [1, 1]} : vector<2x384xf32> to vector<2x128xf32>
    %84 = arith.addf %82, %83 : vector<2x128xf32>
    %85 = arith.negf %84 : vector<2x128xf32>
    %86 = math.exp %85 : vector<2x128xf32>
    %cst_23 = arith.constant 1.000000e+00 : f32
    %87 = vector.broadcast %cst_23 : f32 to vector<2x128xf32>
    %88 = arith.addf %87, %86 : vector<2x128xf32>
    %89 = arith.divf %87, %88 : vector<2x128xf32>
    %90 = vector.extract_strided_slice %14 {offsets = [4, 0], sizes = [2, 128], strides = [1, 1]} : vector<16x128xf32> to vector<2x128xf32>
    %91 = vector.extract_strided_slice %81 {offsets = [0, 128], sizes = [2, 128], strides = [1, 1]} : vector<2x384xf32> to vector<2x128xf32>
    %92 = arith.addf %90, %91 : vector<2x128xf32>
    %93 = arith.negf %92 : vector<2x128xf32>
    %94 = math.exp %93 : vector<2x128xf32>
    %cst_24 = arith.constant 1.000000e+00 : f32
    %95 = vector.broadcast %cst_24 : f32 to vector<2x128xf32>
    %96 = arith.addf %95, %94 : vector<2x128xf32>
    %97 = arith.divf %95, %96 : vector<2x128xf32>
    %98 = vector.extract_strided_slice %15 {offsets = [4, 0], sizes = [2, 128], strides = [1, 1]} : vector<16x128xf32> to vector<2x128xf32>
    %99 = vector.extract_strided_slice %81 {offsets = [0, 256], sizes = [2, 128], strides = [1, 1]} : vector<2x384xf32> to vector<2x128xf32>
    %100 = arith.mulf %89, %99 : vector<2x128xf32>
    %101 = arith.addf %98, %100 : vector<2x128xf32>
    %102 = math.tanh %101 : vector<2x128xf32>
    %cst_25 = arith.constant 1.000000e+00 : f32
    %103 = vector.broadcast %cst_25 : f32 to vector<2x128xf32>
    %104 = arith.subf %103, %97 : vector<2x128xf32>
    %105 = arith.mulf %104, %102 : vector<2x128xf32>
    %106 = arith.mulf %97, %78 : vector<2x128xf32>
    %107 = arith.addf %105, %106 : vector<2x128xf32>
    %108 = vector.extract_strided_slice %107 {offsets = [0, 0], sizes = [2, 32], strides = [1, 1]} : vector<2x128xf32> to vector<2x32xf32>
    %cst_26 = arith.constant dense<0.000000e+00> : vector<2x384xf32>
    %109 = tpu.matmul %108, %16, %cst_26 {dimension_numbers = #tpu.dot_dimension_numbers<[1], [0], [0], [1], [0, 0, 1, 1], [], []>} : vector<2x32xf32>, vector<32x384xf32>, vector<2x384xf32> -> vector<2x384xf32>
    %110 = arith.addf %109, %19 : vector<2x384xf32>
    %111 = vector.extract_strided_slice %13 {offsets = [6, 0], sizes = [2, 128], strides = [1, 1]} : vector<16x128xf32> to vector<2x128xf32>
    %112 = vector.extract_strided_slice %110 {offsets = [0, 0], sizes = [2, 128], strides = [1, 1]} : vector<2x384xf32> to vector<2x128xf32>
    %113 = arith.addf %111, %112 : vector<2x128xf32>
    %114 = arith.negf %113 : vector<2x128xf32>
    %115 = math.exp %114 : vector<2x128xf32>
    %cst_27 = arith.constant 1.000000e+00 : f32
    %116 = vector.broadcast %cst_27 : f32 to vector<2x128xf32>
    %117 = arith.addf %116, %115 : vector<2x128xf32>
    %118 = arith.divf %116, %117 : vector<2x128xf32>
    %119 = vector.extract_strided_slice %14 {offsets = [6, 0], sizes = [2, 128], strides = [1, 1]} : vector<16x128xf32> to vector<2x128xf32>
    %120 = vector.extract_strided_slice %110 {offsets = [0, 128], sizes = [2, 128], strides = [1, 1]} : vector<2x384xf32> to vector<2x128xf32>
    %121 = arith.addf %119, %120 : vector<2x128xf32>
    %122 = arith.negf %121 : vector<2x128xf32>
    %123 = math.exp %122 : vector<2x128xf32>
    %cst_28 = arith.constant 1.000000e+00 : f32
    %124 = vector.broadcast %cst_28 : f32 to vector<2x128xf32>
    %125 = arith.addf %124, %123 : vector<2x128xf32>
    %126 = arith.divf %124, %125 : vector<2x128xf32>
    %127 = vector.extract_strided_slice %15 {offsets = [6, 0], sizes = [2, 128], strides = [1, 1]} : vector<16x128xf32> to vector<2x128xf32>
    %128 = vector.extract_strided_slice %110 {offsets = [0, 256], sizes = [2, 128], strides = [1, 1]} : vector<2x384xf32> to vector<2x128xf32>
    %129 = arith.mulf %118, %128 : vector<2x128xf32>
    %130 = arith.addf %127, %129 : vector<2x128xf32>
    %131 = math.tanh %130 : vector<2x128xf32>
    %cst_29 = arith.constant 1.000000e+00 : f32
    %132 = vector.broadcast %cst_29 : f32 to vector<2x128xf32>
    %133 = arith.subf %132, %126 : vector<2x128xf32>
    %134 = arith.mulf %133, %131 : vector<2x128xf32>
    %135 = arith.mulf %126, %107 : vector<2x128xf32>
    %136 = arith.addf %134, %135 : vector<2x128xf32>
    %137 = vector.extract_strided_slice %136 {offsets = [0, 0], sizes = [2, 32], strides = [1, 1]} : vector<2x128xf32> to vector<2x32xf32>
    %cst_30 = arith.constant dense<0.000000e+00> : vector<2x384xf32>
    %138 = tpu.matmul %137, %16, %cst_30 {dimension_numbers = #tpu.dot_dimension_numbers<[1], [0], [0], [1], [0, 0, 1, 1], [], []>} : vector<2x32xf32>, vector<32x384xf32>, vector<2x384xf32> -> vector<2x384xf32>
    %139 = arith.addf %138, %19 : vector<2x384xf32>
    %140 = vector.extract_strided_slice %13 {offsets = [8, 0], sizes = [2, 128], strides = [1, 1]} : vector<16x128xf32> to vector<2x128xf32>
    %141 = vector.extract_strided_slice %139 {offsets = [0, 0], sizes = [2, 128], strides = [1, 1]} : vector<2x384xf32> to vector<2x128xf32>
    %142 = arith.addf %140, %141 : vector<2x128xf32>
    %143 = arith.negf %142 : vector<2x128xf32>
    %144 = math.exp %143 : vector<2x128xf32>
    %cst_31 = arith.constant 1.000000e+00 : f32
    %145 = vector.broadcast %cst_31 : f32 to vector<2x128xf32>
    %146 = arith.addf %145, %144 : vector<2x128xf32>
    %147 = arith.divf %145, %146 : vector<2x128xf32>
    %148 = vector.extract_strided_slice %14 {offsets = [8, 0], sizes = [2, 128], strides = [1, 1]} : vector<16x128xf32> to vector<2x128xf32>
    %149 = vector.extract_strided_slice %139 {offsets = [0, 128], sizes = [2, 128], strides = [1, 1]} : vector<2x384xf32> to vector<2x128xf32>
    %150 = arith.addf %148, %149 : vector<2x128xf32>
    %151 = arith.negf %150 : vector<2x128xf32>
    %152 = math.exp %151 : vector<2x128xf32>
    %cst_32 = arith.constant 1.000000e+00 : f32
    %153 = vector.broadcast %cst_32 : f32 to vector<2x128xf32>
    %154 = arith.addf %153, %152 : vector<2x128xf32>
    %155 = arith.divf %153, %154 : vector<2x128xf32>
    %156 = vector.extract_strided_slice %15 {offsets = [8, 0], sizes = [2, 128], strides = [1, 1]} : vector<16x128xf32> to vector<2x128xf32>
    %157 = vector.extract_strided_slice %139 {offsets = [0, 256], sizes = [2, 128], strides = [1, 1]} : vector<2x384xf32> to vector<2x128xf32>
    %158 = arith.mulf %147, %157 : vector<2x128xf32>
    %159 = arith.addf %156, %158 : vector<2x128xf32>
    %160 = math.tanh %159 : vector<2x128xf32>
    %cst_33 = arith.constant 1.000000e+00 : f32
    %161 = vector.broadcast %cst_33 : f32 to vector<2x128xf32>
    %162 = arith.subf %161, %155 : vector<2x128xf32>
    %163 = arith.mulf %162, %160 : vector<2x128xf32>
    %164 = arith.mulf %155, %136 : vector<2x128xf32>
    %165 = arith.addf %163, %164 : vector<2x128xf32>
    %166 = vector.extract_strided_slice %165 {offsets = [0, 0], sizes = [2, 32], strides = [1, 1]} : vector<2x128xf32> to vector<2x32xf32>
    %cst_34 = arith.constant dense<0.000000e+00> : vector<2x384xf32>
    %167 = tpu.matmul %166, %16, %cst_34 {dimension_numbers = #tpu.dot_dimension_numbers<[1], [0], [0], [1], [0, 0, 1, 1], [], []>} : vector<2x32xf32>, vector<32x384xf32>, vector<2x384xf32> -> vector<2x384xf32>
    %168 = arith.addf %167, %19 : vector<2x384xf32>
    %169 = vector.extract_strided_slice %13 {offsets = [10, 0], sizes = [2, 128], strides = [1, 1]} : vector<16x128xf32> to vector<2x128xf32>
    %170 = vector.extract_strided_slice %168 {offsets = [0, 0], sizes = [2, 128], strides = [1, 1]} : vector<2x384xf32> to vector<2x128xf32>
    %171 = arith.addf %169, %170 : vector<2x128xf32>
    %172 = arith.negf %171 : vector<2x128xf32>
    %173 = math.exp %172 : vector<2x128xf32>
    %cst_35 = arith.constant 1.000000e+00 : f32
    %174 = vector.broadcast %cst_35 : f32 to vector<2x128xf32>
    %175 = arith.addf %174, %173 : vector<2x128xf32>
    %176 = arith.divf %174, %175 : vector<2x128xf32>
    %177 = vector.extract_strided_slice %14 {offsets = [10, 0], sizes = [2, 128], strides = [1, 1]} : vector<16x128xf32> to vector<2x128xf32>
    %178 = vector.extract_strided_slice %168 {offsets = [0, 128], sizes = [2, 128], strides = [1, 1]} : vector<2x384xf32> to vector<2x128xf32>
    %179 = arith.addf %177, %178 : vector<2x128xf32>
    %180 = arith.negf %179 : vector<2x128xf32>
    %181 = math.exp %180 : vector<2x128xf32>
    %cst_36 = arith.constant 1.000000e+00 : f32
    %182 = vector.broadcast %cst_36 : f32 to vector<2x128xf32>
    %183 = arith.addf %182, %181 : vector<2x128xf32>
    %184 = arith.divf %182, %183 : vector<2x128xf32>
    %185 = vector.extract_strided_slice %15 {offsets = [10, 0], sizes = [2, 128], strides = [1, 1]} : vector<16x128xf32> to vector<2x128xf32>
    %186 = vector.extract_strided_slice %168 {offsets = [0, 256], sizes = [2, 128], strides = [1, 1]} : vector<2x384xf32> to vector<2x128xf32>
    %187 = arith.mulf %176, %186 : vector<2x128xf32>
    %188 = arith.addf %185, %187 : vector<2x128xf32>
    %189 = math.tanh %188 : vector<2x128xf32>
    %cst_37 = arith.constant 1.000000e+00 : f32
    %190 = vector.broadcast %cst_37 : f32 to vector<2x128xf32>
    %191 = arith.subf %190, %184 : vector<2x128xf32>
    %192 = arith.mulf %191, %189 : vector<2x128xf32>
    %193 = arith.mulf %184, %165 : vector<2x128xf32>
    %194 = arith.addf %192, %193 : vector<2x128xf32>
    %195 = vector.extract_strided_slice %194 {offsets = [0, 0], sizes = [2, 32], strides = [1, 1]} : vector<2x128xf32> to vector<2x32xf32>
    %cst_38 = arith.constant dense<0.000000e+00> : vector<2x384xf32>
    %196 = tpu.matmul %195, %16, %cst_38 {dimension_numbers = #tpu.dot_dimension_numbers<[1], [0], [0], [1], [0, 0, 1, 1], [], []>} : vector<2x32xf32>, vector<32x384xf32>, vector<2x384xf32> -> vector<2x384xf32>
    %197 = arith.addf %196, %19 : vector<2x384xf32>
    %198 = vector.extract_strided_slice %13 {offsets = [12, 0], sizes = [2, 128], strides = [1, 1]} : vector<16x128xf32> to vector<2x128xf32>
    %199 = vector.extract_strided_slice %197 {offsets = [0, 0], sizes = [2, 128], strides = [1, 1]} : vector<2x384xf32> to vector<2x128xf32>
    %200 = arith.addf %198, %199 : vector<2x128xf32>
    %201 = arith.negf %200 : vector<2x128xf32>
    %202 = math.exp %201 : vector<2x128xf32>
    %cst_39 = arith.constant 1.000000e+00 : f32
    %203 = vector.broadcast %cst_39 : f32 to vector<2x128xf32>
    %204 = arith.addf %203, %202 : vector<2x128xf32>
    %205 = arith.divf %203, %204 : vector<2x128xf32>
    %206 = vector.extract_strided_slice %14 {offsets = [12, 0], sizes = [2, 128], strides = [1, 1]} : vector<16x128xf32> to vector<2x128xf32>
    %207 = vector.extract_strided_slice %197 {offsets = [0, 128], sizes = [2, 128], strides = [1, 1]} : vector<2x384xf32> to vector<2x128xf32>
    %208 = arith.addf %206, %207 : vector<2x128xf32>
    %209 = arith.negf %208 : vector<2x128xf32>
    %210 = math.exp %209 : vector<2x128xf32>
    %cst_40 = arith.constant 1.000000e+00 : f32
    %211 = vector.broadcast %cst_40 : f32 to vector<2x128xf32>
    %212 = arith.addf %211, %210 : vector<2x128xf32>
    %213 = arith.divf %211, %212 : vector<2x128xf32>
    %214 = vector.extract_strided_slice %15 {offsets = [12, 0], sizes = [2, 128], strides = [1, 1]} : vector<16x128xf32> to vector<2x128xf32>
    %215 = vector.extract_strided_slice %197 {offsets = [0, 256], sizes = [2, 128], strides = [1, 1]} : vector<2x384xf32> to vector<2x128xf32>
    %216 = arith.mulf %205, %215 : vector<2x128xf32>
    %217 = arith.addf %214, %216 : vector<2x128xf32>
    %218 = math.tanh %217 : vector<2x128xf32>
    %cst_41 = arith.constant 1.000000e+00 : f32
    %219 = vector.broadcast %cst_41 : f32 to vector<2x128xf32>
    %220 = arith.subf %219, %213 : vector<2x128xf32>
    %221 = arith.mulf %220, %218 : vector<2x128xf32>
    %222 = arith.mulf %213, %194 : vector<2x128xf32>
    %223 = arith.addf %221, %222 : vector<2x128xf32>
    %224 = vector.extract_strided_slice %223 {offsets = [0, 0], sizes = [2, 32], strides = [1, 1]} : vector<2x128xf32> to vector<2x32xf32>
    %cst_42 = arith.constant dense<0.000000e+00> : vector<2x384xf32>
    %225 = tpu.matmul %224, %16, %cst_42 {dimension_numbers = #tpu.dot_dimension_numbers<[1], [0], [0], [1], [0, 0, 1, 1], [], []>} : vector<2x32xf32>, vector<32x384xf32>, vector<2x384xf32> -> vector<2x384xf32>
    %226 = arith.addf %225, %19 : vector<2x384xf32>
    %227 = vector.extract_strided_slice %13 {offsets = [14, 0], sizes = [2, 128], strides = [1, 1]} : vector<16x128xf32> to vector<2x128xf32>
    %228 = vector.extract_strided_slice %226 {offsets = [0, 0], sizes = [2, 128], strides = [1, 1]} : vector<2x384xf32> to vector<2x128xf32>
    %229 = arith.addf %227, %228 : vector<2x128xf32>
    %230 = arith.negf %229 : vector<2x128xf32>
    %231 = math.exp %230 : vector<2x128xf32>
    %cst_43 = arith.constant 1.000000e+00 : f32
    %232 = vector.broadcast %cst_43 : f32 to vector<2x128xf32>
    %233 = arith.addf %232, %231 : vector<2x128xf32>
    %234 = arith.divf %232, %233 : vector<2x128xf32>
    %235 = vector.extract_strided_slice %14 {offsets = [14, 0], sizes = [2, 128], strides = [1, 1]} : vector<16x128xf32> to vector<2x128xf32>
    %236 = vector.extract_strided_slice %226 {offsets = [0, 128], sizes = [2, 128], strides = [1, 1]} : vector<2x384xf32> to vector<2x128xf32>
    %237 = arith.addf %235, %236 : vector<2x128xf32>
    %238 = arith.negf %237 : vector<2x128xf32>
    %239 = math.exp %238 : vector<2x128xf32>
    %cst_44 = arith.constant 1.000000e+00 : f32
    %240 = vector.broadcast %cst_44 : f32 to vector<2x128xf32>
    %241 = arith.addf %240, %239 : vector<2x128xf32>
    %242 = arith.divf %240, %241 : vector<2x128xf32>
    %243 = vector.extract_strided_slice %15 {offsets = [14, 0], sizes = [2, 128], strides = [1, 1]} : vector<16x128xf32> to vector<2x128xf32>
    %244 = vector.extract_strided_slice %226 {offsets = [0, 256], sizes = [2, 128], strides = [1, 1]} : vector<2x384xf32> to vector<2x128xf32>
    %245 = arith.mulf %234, %244 : vector<2x128xf32>
    %246 = arith.addf %243, %245 : vector<2x128xf32>
    %247 = math.tanh %246 : vector<2x128xf32>
    %cst_45 = arith.constant 1.000000e+00 : f32
    %248 = vector.broadcast %cst_45 : f32 to vector<2x128xf32>
    %249 = arith.subf %248, %242 : vector<2x128xf32>
    %250 = arith.mulf %249, %247 : vector<2x128xf32>
    %251 = arith.mulf %242, %223 : vector<2x128xf32>
    %252 = arith.addf %250, %251 : vector<2x128xf32>
    %253 = vector.extract_strided_slice %252 {offsets = [0, 0], sizes = [2, 32], strides = [1, 1]} : vector<2x128xf32> to vector<2x32xf32>
    %c0_46 = arith.constant 0 : index
    %c0_47 = arith.constant 0 : index
    %254 = vector.load %arg4[%c0_46, %c0_47] : memref<32x128xf32, #tpu.memory_space<vmem>>, vector<32x128xf32>
    %cst_48 = arith.constant dense<0.000000e+00> : vector<2x128xf32>
    %255 = tpu.matmul %253, %254, %cst_48 {dimension_numbers = #tpu.dot_dimension_numbers<[1], [0], [0], [1], [0, 0, 1, 1], [], []>} : vector<2x32xf32>, vector<32x128xf32>, vector<2x128xf32> -> vector<2x128xf32>
    %c3 = arith.constant 3 : index
    %c0_49 = arith.constant 0 : index
    %256 = vector.load %arg5[%c3, %c0_49] : memref<4x384xf32, #tpu.memory_space<vmem>>, vector<1x128xf32>
    %257 = vector.broadcast %256 : vector<1x128xf32> to vector<2x128xf32>
    %258 = arith.addf %255, %257 : vector<2x128xf32>
    %c0_50 = arith.constant 0 : index
    %c0_51 = arith.constant 0 : index
    %259 = vector.load %arg6[%c0_50, %c0_51] : memref<2x128xf32, #tpu.memory_space<vmem>>, vector<2x128xf32>
    tpu.vector_store %arg6[%c0_50, %c0_51], %258 {strides = array<i32>} : memref<2x128xf32, #tpu.memory_space<vmem>>, vector<2x128xf32>,
    return
  }
}

</mosaic_0001>

<bundles_post_ra>
// kernel: tpu_custom_call.1
= control target key start
LH: loop header
LB: loop body
LE: loop exit
PB: predicated region body
PF: predicated region fallthrough
CT: control target
= control target key end

     0   :  { %11 = vsyncpa [#allocation3], 0  ;;  %s1806_s0 = inlined_call_operand.vmem [shape: f32[16,4], index: 0, kind: input, shape index: {}]   ;;  %s1807_s1 = inlined_call_operand.vmem [shape: f32[4,32], index: 1, kind: input, shape index: {}]   ;;  %s1808_s2 = inlined_call_operand.hbm [shape: f32[32,384], index: 2, kind: input, shape index: {}]   ;;  %s1809_s3 = inlined_call_operand.hbm [shape: f32[32,384], index: 3, kind: input, shape index: {}]   ;;  %s1810_s4 = inlined_call_operand.hbm [shape: f32[32,128], index: 4, kind: input, shape index: {}]   ;;  %s1811_s5 = inlined_call_operand.vmem [shape: f32[4,384], index: 5, kind: input, shape index: {}]   ;;  %s1812_s6 = inlined_call_operand.hbm [shape: f32[2,128], index: 6, kind: output, shape index: {}]  }
   0x1   :  { %12 = vsyncpa [#allocation6], 0 }
   0x2   :  { %13 = vsyncpa [#allocation4], 0  ;;  %s35_s23 = sshll.u32 %s1809_s3, 4  ;;  %s1473_s24 = smov [#allocation5]   ;;  %s36_s23 = int_to_ptr.hbm [resolvable:$true] %s35_s23 }
   0x3   :  { %s37_s25 = sshll.u32 %s1473_s24, 4  ;;  %s22_s28 = sshll.u32 %s1808_s2, 4  ;;  %s38_s25 = int_to_ptr.vmem [resolvable:$true] %s37_s25  ;;  %s23_s28 = int_to_ptr.hbm [resolvable:$true] %s22_s28 }
   0x4   :  { %s1474_s29 = smov 384   ;;  %s1475_s30 = smov 24  }
   0x5   :  { %43 = dma.hbm_to_vmem [thread:$0]  %s36_s23, 1536, %s38_s25, [#allocation6], %s1474_s29, %s1474_s29, %s1475_s30  }
   0x6   :  { %s1476_s7 = smov [#allocation2]   ;;  %s48_s11 = sshll.u32 %s1810_s4, 4  ;;  %s49_s11 = int_to_ptr.hbm [resolvable:$true] %s48_s11 }
   0x7   :  { %s24_s8 = sshll.u32 %s1476_s7, 4  ;;  %s1477_s3 = smov [#allocation7]   ;;  %s25_s8 = int_to_ptr.vmem [resolvable:$true] %s24_s8 }
   0x8   :  { %30 = dma.hbm_to_vmem [thread:$0]  %s23_s28, 1536, %s25_s8, [#allocation3], %s1474_s29, %s1474_s29, %s1475_s30  }
   0x9   :  { %s50_s12 = sshll.u32 %s1477_s3, 4  ;;  %s1478_s13 = smov 128   ;;  %s51_s12 = int_to_ptr.vmem [resolvable:$true] %s50_s12 }
   0xa   :  { %s1479_s14 = smov 8  }
   0xb   :  { %56 = dma.hbm_to_vmem [thread:$0]  %s49_s11, 512, %s51_s12, [#allocation6], %s1478_s13, %s1478_s13, %s1479_s14  }
   0xc   :  { %1467 = dma.done.wait [#allocation3], 1536  }
   0xd   :  { %1468 = vsyncadd [#allocation3], 4294965760 }
   0xe   :  { %1469 = dma.done.wait [#allocation6], 2048  }
   0xf   :  { %1470 = vsyncadd [#allocation6], 4294965248  ;;  %vm83_vm0 = vcmask 1043456   ;;  %vm76_vm1 = vcmask 31744   ;;  %v73_v0 = vld [vmem:[%s1807_s1] sm:$0xf] }
  0x10   :  { %v71_v1 = vld [vmem:[%s1806_s0] sm:$0xff]  ;;  %1231 = vmatpush.msk.msra.mxu0 %vm83_vm0, %v73_v0  ;;  %v1532_v2 = vld [vmem:[#allocation5 + $0x48] sm:$0xff]  ;;  %v122_v4 = vld [vmem:[#allocation2 + $0x50] sm:$0xff]  ;;  %v1480_v19 = vmov 0.0   ;;  %vm133_vm2 = vcmask 261120   ;;  %s1481_s25 = smov [#allocation8]  }
  0x11   :  { %v121_v3 = vld [vmem:[#allocation2 + $0x48] sm:$0xff]  ;;  %1232 = vmatmul.msk.f32.vlgmr.msra.gmra.mxu0 %vm76_vm1, %v71_v1  ;;  %v123_v5 = vld [vmem:[#allocation2 + $0x58] sm:$0xff]  ;;  %175 = vmatpush.msra.mxu2 %v122_v4  ;;  %v118_v7 = vld [vmem:[#allocation2 + $0x30] sm:$0xff]  ;;  %s1218_s26 = sshll.u32 %s1481_s25, 4  ;;  %s1220_s29 = sshll.u32 %s1812_s6, 4  ;;  %s1219_s26 = int_to_ptr.vmem [resolvable:$true] %s1218_s26  ;;  %s1221_s29 = int_to_ptr.hbm [resolvable:$true] %s1220_s29 }
  0x12   :  { %152 = vmatpush.msra.mxu1 %v121_v3  ;;  %245 = vmatpush.msrb.mxu0 %v1532_v2  ;;  %v72_v6 = vld [vmem:[%s1806_s0 + $0x8] sm:$0xff]  ;;  %v119_v8 = vld [vmem:[#allocation2 + $0x38] sm:$0xff]  ;;  %v120_v9 = vld [vmem:[#allocation2 + $0x40] sm:$0xff] }
  0x13   :  { %198 = vmatpush.msra.mxu3 %v123_v5  ;;  %176 = vmatpush.msra.mxu2 %v119_v8  ;;  %v1538_v10 = vld [vmem:[#allocation5 + $0x30] sm:$0xff]  ;;  %v115_v11 = vld [vmem:[#allocation2 + $0x18] sm:$0xff]  ;;  %v116_v12 = vld [vmem:[#allocation2 + $0x20] sm:$0xff] }
  0x14   :  { %153 = vmatpush.msra.mxu1 %v118_v7  ;;  %246 = vmatpush.msrb.mxu0 %v1538_v10  ;;  %v117_v13 = vld [vmem:[#allocation2 + $0x28] sm:$0xff]  ;;  %v1541_v14 = vld [vmem:[#allocation5 + $0x18] sm:$0xff]  ;;  %v112_v15 = vld [vmem:[#allocation2] sm:$0xff] }
  0x15   :  { %199 = vmatpush.msra.mxu3 %v120_v9  ;;  %177 = vmatpush.msra.mxu2 %v116_v12  ;;  %v113_v16 = vld [vmem:[#allocation2 + $0x8] sm:$0xff]  ;;  %v114_v17 = vld [vmem:[#allocation2 + $0x10] sm:$0xff]  ;;  %v1544_v18 = vld [vmem:[#allocation5] sm:$0xff] }
  0x16   :  { %154 = vmatpush.msra.mxu1 %v115_v11  ;;  %247 = vmatpush.msrb.mxu0 %v1541_v14  ;;  %v1547_v20 = vld [vmem:[#allocation5 + $0x50] sm:$0xff]  ;;  %v1554_v21 = vld [vmem:[#allocation5 + $0x38] sm:$0xff]  ;;  %v1559_v22 = vld [vmem:[#allocation5 + $0x20] sm:$0xff] }
  0x17   :  { %200 = vmatpush.msra.mxu3 %v117_v13  ;;  %178 = vmatpush.msra.mxu2 %v113_v16  ;;  %v1561_v23 = vld [vmem:[#allocation5 + $0x8] sm:$0xff]  ;;  %v1563_v24 = vld [vmem:[#allocation5 + $0x58] sm:$0xff]  ;;  %v1571_v25 = vld [vmem:[#allocation5 + $0x40] sm:$0xff] }
  0x18   :  { %155 = vmatpush.msra.mxu1 %v112_v15  ;;  %248 = vmatpush.msrb.mxu0 %v1544_v18  ;;  %v1573_v26 = vld [vmem:[#allocation5 + $0x28] sm:$0xff]  ;;  %v1577_v27 = vld [vmem:[#allocation5 + $0x10] sm:$0xff]  ;;  %v1289_v28 = vld [vmem:[%s1811_s5] ss:$0 sm:$0xff] }
  0x19   :  { %1233 = vmatmul.msk.f32.gmra.mxu0 %vm76_vm1, %v72_v6  ;;  %201 = vmatpush.msra.mxu3 %v114_v17  ;;  %v1241_v35 = vld [vmem:[%s1811_s5 + $0x2] ss:$4 sm:$0x7]  ;;  %v1618_v36 = vld [vmem:[%s1811_s5 + $0x1] ss:$4 sm:$0x7] }
  0x1a   :  { %265 = vmatpush.msrb.mxu1 %v1547_v20  ;;  %375 = vmatpush.msra.mxu0 %v1547_v20  ;;  %v1620_v37 = vperm.slane %v1241_v35, 0  ;;  %v127_v39 = vperm.slane %v1618_v36, 0  ;;  %v128_v49 = vperm.slane %v1618_v36, 1  ;;  %v1630_v50 = vperm.slane %v1241_v35, 1 }
  0x1b   :  { %355 = vmatpush.msrb.mxu3 %v1532_v2  ;;  %285 = vmatpush.msrb.mxu2 %v1563_v24  ;;  %v1638_v0 = vperm.slane %v1241_v35, 2  ;;  %v129_v12 = vperm.slane %v1618_v36, 2 }
  0x1c   :  { %266 = vmatpush.msrb.mxu1 %v1554_v21  ;;  %376 = vmatpush.msra.mxu0 %v1554_v21 }
  0x1d   :  { %356 = vmatpush.msrb.mxu3 %v1538_v10  ;;  %286 = vmatpush.msrb.mxu2 %v1571_v25 }
  0x1e   :  { %267 = vmatpush.msrb.mxu1 %v1559_v22  ;;  %377 = vmatpush.msra.mxu0 %v1559_v22 }
  0x1f   :  { %357 = vmatpush.msrb.mxu3 %v1541_v14  ;;  %287 = vmatpush.msrb.mxu2 %v1573_v26 }
  0x20   :  { %268 = vmatpush.msrb.mxu1 %v1561_v23  ;;  %378 = vmatpush.msra.mxu0 %v1561_v23 }
  0x21   :  { %249 = vmatmul.f32.vlgmr.msrb.gmra.mxu0 %v1480_v19  ;;  %358 = vmatpush.msrb.mxu3 %v1544_v18 }
  0x22   :  { %517 = vmatpush.msrb.mxu0 %v1563_v24  ;;  %288 = vmatpush.msrb.mxu2 %v1577_v27 }
  0x24   :  { %518 = vmatpush.msrb.mxu0 %v1571_v25 }
  0x26   :  { %519 = vmatpush.msrb.mxu0 %v1573_v26 }
  0x28   :  { %520 = vmatpush.msrb.mxu0 %v1577_v27 }
  0x8e   :  { %v104_v29 = vpop.f32.mrf.mxu0 }
  0x8f   :  { %v105_v30 = vadd.f32 %v1289_v28, %v104_v29 }
  0x91   :  { %v110_v31 = vmax.f32 %v105_v30, 0.0 }
  0x93   :  { %1235 = vmatmul.msk.f32.vlgmr.msra.gmra.mxu1 %vm133_vm2, %v110_v31  ;;  %1237 = vmatmul.msk.f32.vlgmr.msra.gmra.mxu2 %vm133_vm2, %v110_v31 }
  0x94   :  { %1239 = vmatmul.msk.f32.vlgmr.msra.gmra.mxu3 %vm133_vm2, %v110_v31  ;;  %395 = vmatpush.msra.mxu1 %v1563_v24 }
  0x95   :  { %477 = vmatpush.msra.mxu2 %v1532_v2  ;;  %497 = vmatpush.msra.mxu3 %v1547_v20 }
  0x96   :  { %v107_v32 = vpop.f32.mrf.mxu0  ;;  %396 = vmatpush.msra.mxu1 %v1571_v25 }
  0x97   :  { %v108_v33 = vadd.f32 %v1289_v28, %v107_v32  ;;  %478 = vmatpush.msra.mxu2 %v1538_v10  ;;  %498 = vmatpush.msra.mxu3 %v1554_v21 }
  0x98   :  { %397 = vmatpush.msra.mxu1 %v1573_v26 }
  0x99   :  { %v111_v34 = vmax.f32 %v108_v33, 0.0  ;;  %479 = vmatpush.msra.mxu2 %v1541_v14  ;;  %499 = vmatpush.msra.mxu3 %v1559_v22 }
  0x9a   :  { %398 = vmatpush.msra.mxu1 %v1577_v27 }
  0x9b   :  { %1236 = vmatmul.msk.f32.gmra.mxu1 %vm133_vm2, %v111_v34  ;;  %1238 = vmatmul.msk.f32.gmra.mxu2 %vm133_vm2, %v111_v34 }
  0x9c   :  { %1240 = vmatmul.msk.f32.gmra.mxu3 %vm133_vm2, %v111_v34  ;;  %480 = vmatpush.msra.mxu2 %v1544_v18 }
  0x9d   :  { %500 = vmatpush.msra.mxu3 %v1561_v23 }
  0x9e   :  { %v250_v38 = vpop.f32.mrf.mxu0 }
  0x9f   :  { %v251_v40 = vadd.f32 %v250_v38, %v1620_v37 }
  0xa3   :  { %269 = vmatmul.f32.vlgmr.msrb.gmra.mxu1 %v1480_v19  ;;  %289 = vmatmul.f32.vlgmr.msrb.gmra.mxu2 %v1480_v19 }
  0xa4   :  { %599 = vmatpush.msrb.mxu1 %v1532_v2  ;;  %619 = vmatpush.msrb.mxu2 %v1547_v20 }
  0xa6   :  { %600 = vmatpush.msrb.mxu1 %v1538_v10  ;;  %620 = vmatpush.msrb.mxu2 %v1554_v21 }
  0xa8   :  { %601 = vmatpush.msrb.mxu1 %v1541_v14  ;;  %621 = vmatpush.msrb.mxu2 %v1559_v22 }
  0xaa   :  { %602 = vmatpush.msrb.mxu1 %v1544_v18  ;;  %622 = vmatpush.msrb.mxu2 %v1561_v23 }
 0x110   :  { %v157_v41 = vpop.f32.mrf.mxu1 }
 0x111   :  { %v1624_v42 = vadd.f32 %v157_v41, %v127_v39 }
 0x113   :  { %v293_v43 = vadd.f32 %v251_v40, %v1624_v42 }
 0x115   :  { %v1242_v44 = vmul.f32 -1.442695, %v293_v43 }
 0x116   :  { %v180_v45 = vpop.f32.mrf.mxu2 }
 0x117   :  { %1291 = vpow2.f32 %v1242_v44  ;;  %v1634_v55 = vadd.f32 %v180_v45, %v128_v49  ;;  %v203_v13 = vpop.f32.mrf.mxu3 }
 0x118   :  { %v160_v46 = vpop.f32.mrf.mxu1  ;;  %v1644_v17 = vadd.f32 %v203_v13, %v129_v12 }
 0x119   :  { %v1627_v47 = vadd.f32 %v160_v46, %v127_v39 }
 0x11d   :  { %v1292_v48 = vpop.eup %1291 }
 0x11e   :  { %v297_v51 = vadd.f32 1.0, %v1292_v48  ;;  %v183_v52 = vpop.f32.mrf.mxu2 }
 0x11f   :  { %v1632_v53 = vadd.f32 %v183_v52, %v128_v49  ;;  %v1667_v45 = vpop.f32.mrf.mxu3 }
 0x120   :  { %1293 = vrcp.f32 %v297_v51  ;;  %v270_v54 = vpop.f32.mrf.mxu1  ;;  %v309_v63 = vand.u32 2147483648, %v297_v51  ;;  %v307_v1 = vand.u32 2147483647, %v297_v51  ;;  %vm303_vm4 = vweird.f32 %v297_v51 }
 0x121   :  { %v271_v56 = vadd.f32 %v270_v54, %v1630_v50 }
 0x122   :  { %v310_v8 = vor.u32 1.1754944e-38, %v309_v63  ;;  %vm308_vm6 = vcmp.eq.f32.partialorder %v307_v1, 8.507059e+37 }
 0x123   :  { %v313_v57 = vadd.f32 %v271_v56, %v1634_v55 }
 0x125   :  { %v1243_v58 = vmul.f32 -1.442695, %v313_v57 }
 0x126   :  { %v1294_v59 = vpop.eup %1293  ;;  %v290_v4 = vpop.f32.mrf.mxu2 }
 0x127   :  { %1295 = vpow2.f32 %v1243_v58  ;;  %v299_v60 = vmul.f32 %v1294_v59, %v297_v51  ;;  %vm304_vm3 = vweird.f32 %v1294_v59  ;;  %v291_v9 = vadd.f32 %v290_v4, %v1638_v0 }
 0x128   :  { %vm305_vm5 = vmor %vm303_vm4, %vm304_vm3 }
 0x129   :  { %v300_v61 = vsub.f32 1.0, %v299_v60 }
 0x12b   :  { %v301_v62 = vmul.f32 %v1294_v59, %v300_v61 }
 0x12d   :  { %v1296_v3 = vpop.eup %1295  ;;  %v302_v5 = vadd.f32 %v1294_v59, %v301_v62 }
 0x12e   :  { %v317_v6 = vadd.f32 1.0, %v1296_v3 }
 0x12f   :  { %v306_v7 = vsel %vm305_vm5, %v1294_v59, %v302_v5 }
 0x130   :  { %1297 = vrcp.f32 %v317_v6  ;;  %v311_v11 = vsel %vm308_vm6, %v310_v8, %v306_v7  ;;  %v329_v30 = vand.u32 2147483648, %v317_v6  ;;  %v327_v32 = vand.u32 2147483647, %v317_v6 }
 0x131   :  { %v333_v15 = vmul.f32 %v311_v11, %v291_v9  ;;  %vm323_vm8 = vweird.f32 %v317_v6 }
 0x132   :  { %v330_v34 = vor.u32 1.1754944e-38, %v329_v30  ;;  %vm328_vm10 = vcmp.eq.f32.partialorder %v327_v32, 8.507059e+37 }
 0x133   :  { %v334_v28 = vadd.f32 %v333_v15, %v1644_v17 }
 0x135   :  { %1299 = vtanh.f32 %v334_v28 }
 0x136   :  { %v1298_v16 = vpop.eup %1297 }
 0x137   :  { %v319_v19 = vmul.f32 %v1298_v16, %v317_v6  ;;  %vm324_vm7 = vweird.f32 %v1298_v16 }
 0x138   :  { %vm325_vm9 = vmor %vm323_vm8, %vm324_vm7 }
 0x139   :  { %v320_v29 = vsub.f32 1.0, %v319_v19 }
 0x13b   :  { %v321_v31 = vmul.f32 %v1298_v16, %v320_v29  ;;  %v1300_v40 = vpop.eup %1299 }
 0x13d   :  { %v322_v33 = vadd.f32 %v1298_v16, %v321_v31 }
 0x13f   :  { %v326_v35 = vsel %vm325_vm9, %v1298_v16, %v322_v33 }
 0x140   :  { %v331_v38 = vsel %vm328_vm10, %v330_v34, %v326_v35 }
 0x141   :  { %v336_v39 = vsub.f32 1.0, %v331_v38  ;;  %v338_v43 = vmul.f32 0.0, %v331_v38 }
 0x143   :  { %v337_v41 = vmul.f32 %v1300_v40, %v336_v39 }
 0x145   :  { %v1647_v44 = vadd.f32 %v338_v43, %v337_v41 }
 0x147   :  { %1244 = vmatmul.msk.f32.vlgmr.msrb.gmra.mxu3 %vm133_vm2, %v1647_v44  ;;  %1245 = vmatmul.msk.f32.vlgmr.msra.gmra.mxu0 %vm133_vm2, %v1647_v44  ;;  %v457_v43 = vrot.slane %v1647_v44, 6 }
 0x148   :  { %1246 = vmatmul.msk.f32.vlgmr.msra.gmra.mxu1 %vm133_vm2, %v1647_v44  ;;  %639 = vmatpush.msrb.mxu3 %v1563_v24 }
 0x149   :  { %721 = vmatpush.msra.mxu0 %v1532_v2  ;;  %741 = vmatpush.msra.mxu1 %v1547_v20 }
 0x14a   :  { %640 = vmatpush.msrb.mxu3 %v1571_v25 }
 0x14b   :  { %722 = vmatpush.msra.mxu0 %v1538_v10  ;;  %742 = vmatpush.msra.mxu1 %v1554_v21 }
 0x14c   :  { %641 = vmatpush.msrb.mxu3 %v1573_v26 }
 0x14d   :  { %723 = vmatpush.msra.mxu0 %v1541_v14  ;;  %743 = vmatpush.msra.mxu1 %v1559_v22 }
 0x14e   :  { %642 = vmatpush.msrb.mxu3 %v1577_v27 }
 0x14f   :  { %724 = vmatpush.msra.mxu0 %v1544_v18  ;;  %744 = vmatpush.msra.mxu1 %v1561_v23 }
 0x1c4   :  { %v380_v46 = vpop.f32.mrf.mxu0 }
 0x1c5   :  { %v381_v48 = vadd.f32 %v380_v46, %v1630_v50  ;;  %v400_v7 = vpop.f32.mrf.mxu1 }
 0x1c6   :  { %v401_v11 = vadd.f32 %v400_v7, %v1638_v0 }
 0x1c7   :  { %v427_v49 = vrot.slane %v381_v48, 6 }
 0x1c8   :  { %v450_v29 = vrot.slane %v401_v11, 6 }
 0x1c9   :  { %v429_v51 = vadd.f32 %v427_v49, %v1634_v55 }
 0x1ca   :  { %v360_v52 = vpop.f32.mrf.mxu3 }
 0x1cb   :  { %v1248_v54 = vmul.f32 -1.442695, %v429_v51  ;;  %v361_v56 = vadd.f32 %v360_v52, %v1620_v37 }
 0x1cd   :  { %1301 = vpow2.f32 %v1248_v54  ;;  %v404_v57 = vrot.slane %v361_v56, 6 }
 0x1cf   :  { %v406_v58 = vadd.f32 %v404_v57, %v1624_v42 }
 0x1d1   :  { %v1247_v59 = vmul.f32 -1.442695, %v406_v58 }
 0x1d3   :  { %v1302_v60 = vpop.eup %1301  ;;  %1303 = vpow2.f32 %v1247_v59 }
 0x1d4   :  { %v433_v61 = vadd.f32 1.0, %v1302_v60 }
 0x1d6   :  { %1305 = vrcp.f32 %v433_v61  ;;  %v445_v33 = vand.u32 2147483648, %v433_v61  ;;  %vm439_vm0 = vweird.f32 %v433_v61  ;;  %v443_v35 = vand.u32 2147483647, %v433_v61 }
 0x1d8   :  { %v446_v40 = vor.u32 1.1754944e-38, %v445_v33  ;;  %vm444_vm3 = vcmp.eq.f32.partialorder %v443_v35, 8.507059e+37 }
 0x1d9   :  { %v1304_v62 = vpop.eup %1303 }
 0x1da   :  { %v410_v63 = vadd.f32 1.0, %v1304_v62 }
 0x1dc   :  { %1307 = vrcp.f32 %v410_v63  ;;  %v1306_v1 = vpop.eup %1305  ;;  %v422_v9 = vand.u32 2147483648, %v410_v63  ;;  %v420_v15 = vand.u32 2147483647, %v410_v63  ;;  %vm416_vm12 = vweird.f32 %v410_v63 }
 0x1dd   :  { %v435_v3 = vmul.f32 %v1306_v1, %v433_v61  ;;  %vm440_vm15 = vweird.f32 %v1306_v1 }
 0x1de   :  { %v423_v28 = vor.u32 1.1754944e-38, %v422_v9  ;;  %vm421_vm14 = vcmp.eq.f32.partialorder %v420_v15, 8.507059e+37  ;;  %vm441_vm1 = vmor %vm439_vm0, %vm440_vm15 }
 0x1df   :  { %v436_v6 = vsub.f32 1.0, %v435_v3 }
 0x1e1   :  { %v437_v16 = vmul.f32 %v1306_v1, %v436_v6 }
 0x1e2   :  { %v1308_v4 = vpop.eup %1307 }
 0x1e3   :  { %v412_v5 = vmul.f32 %v1308_v4, %v410_v63  ;;  %vm417_vm11 = vweird.f32 %v1308_v4  ;;  %v438_v31 = vadd.f32 %v1306_v1, %v437_v16 }
 0x1e4   :  { %vm418_vm13 = vmor %vm416_vm12, %vm417_vm11 }
 0x1e5   :  { %v413_v8 = vsub.f32 1.0, %v412_v5  ;;  %v442_v39 = vsel %vm441_vm1, %v1306_v1, %v438_v31 }
 0x1e6   :  { %v447_v41 = vsel %vm444_vm3, %v446_v40, %v442_v39 }
 0x1e7   :  { %v414_v13 = vmul.f32 %v1308_v4, %v413_v8  ;;  %v455_v46 = vsub.f32 1.0, %v447_v41  ;;  %v459_v51 = vmul.f32 %v457_v43, %v447_v41 }
 0x1e9   :  { %v415_v19 = vadd.f32 %v1308_v4, %v414_v13 }
 0x1eb   :  { %v419_v30 = vsel %vm418_vm13, %v1308_v4, %v415_v19 }
 0x1ec   :  { %v424_v32 = vsel %vm421_vm14, %v423_v28, %v419_v30 }
 0x1ed   :  { %v452_v34 = vmul.f32 %v450_v29, %v424_v32 }
 0x1ef   :  { %v453_v38 = vadd.f32 %v452_v34, %v1644_v17 }
 0x1f1   :  { %1309 = vtanh.f32 %v453_v38 }
 0x1f7   :  { %v1310_v48 = vpop.eup %1309 }
 0x1f8   :  { %v456_v49 = vmul.f32 %v1310_v48, %v455_v46 }
 0x1fa   :  { %v1676_v52 = vadd.f32 %v459_v51, %v456_v49 }
 0x1fc   :  { %v462_v54 = vrot.slane %v1676_v52, 2 }
 0x1fe   :  { %1249 = vmatmul.msk.f32.vlgmr.msra.gmra.mxu2 %vm133_vm2, %v462_v54  ;;  %1250 = vmatmul.msk.f32.vlgmr.msra.gmra.mxu3 %vm133_vm2, %v462_v54 }
 0x1ff   :  { %1251 = vmatmul.msk.f32.vlgmr.msrb.gmra.mxu0 %vm133_vm2, %v462_v54  ;;  %761 = vmatpush.msra.mxu2 %v1563_v24  ;;  %v579_v54 = vrot.slane %v1676_v52, 6 }
 0x200   :  { %832 = vmatpush.msra.mxu3 %v1532_v2  ;;  %852 = vmatpush.msrb.mxu0 %v1547_v20 }
 0x201   :  { %762 = vmatpush.msra.mxu2 %v1571_v25 }
 0x202   :  { %833 = vmatpush.msra.mxu3 %v1538_v10  ;;  %853 = vmatpush.msrb.mxu0 %v1554_v21 }
 0x203   :  { %763 = vmatpush.msra.mxu2 %v1573_v26 }
 0x204   :  { %834 = vmatpush.msra.mxu3 %v1541_v14  ;;  %854 = vmatpush.msrb.mxu0 %v1559_v22 }
 0x205   :  { %764 = vmatpush.msra.mxu2 %v1577_v27 }
 0x206   :  { %835 = vmatpush.msra.mxu3 %v1544_v18  ;;  %855 = vmatpush.msrb.mxu0 %v1561_v23 }
 0x27c   :  { %v522_v11 = vpop.f32.mrf.mxu0 }
 0x27d   :  { %v523_v28 = vadd.f32 %v522_v11, %v1638_v0 }
 0x27f   :  { %v572_v34 = vrot.slane %v523_v28, 4 }
 0x281   :  { %v482_v44 = vpop.f32.mrf.mxu2  ;;  %v502_v56 = vpop.f32.mrf.mxu3 }
 0x282   :  { %v483_v57 = vadd.f32 %v482_v44, %v1620_v37  ;;  %v503_v58 = vadd.f32 %v502_v56, %v1630_v50 }
 0x284   :  { %v526_v59 = vrot.slane %v483_v57, 4  ;;  %v549_v60 = vrot.slane %v503_v58, 4 }
 0x286   :  { %v528_v61 = vadd.f32 %v526_v59, %v1624_v42  ;;  %v551_v62 = vadd.f32 %v549_v60, %v1634_v55 }
 0x288   :  { %v1252_v63 = vmul.f32 -1.442695, %v528_v61  ;;  %v1253_v1 = vmul.f32 -1.442695, %v551_v62 }
 0x28a   :  { %1311 = vpow2.f32 %v1252_v63 }
 0x28b   :  { %1313 = vpow2.f32 %v1253_v1 }
 0x290   :  { %v1312_v3 = vpop.eup %1311 }
 0x291   :  { %v1314_v4 = vpop.eup %1313  ;;  %v532_v5 = vadd.f32 1.0, %v1312_v3 }
 0x292   :  { %v555_v6 = vadd.f32 1.0, %v1314_v4 }
 0x293   :  { %1315 = vrcp.f32 %v532_v5  ;;  %v544_v16 = vand.u32 2147483648, %v532_v5  ;;  %v542_v30 = vand.u32 2147483647, %v532_v5  ;;  %vm538_vm5 = vweird.f32 %v532_v5 }
 0x294   :  { %1317 = vrcp.f32 %v555_v6  ;;  %v567_v41 = vand.u32 2147483648, %v555_v6  ;;  %vm561_vm9 = vweird.f32 %v555_v6  ;;  %v565_v43 = vand.u32 2147483647, %v555_v6 }
 0x295   :  { %v545_v33 = vor.u32 1.1754944e-38, %v544_v16  ;;  %vm543_vm7 = vcmp.eq.f32.partialorder %v542_v30, 8.507059e+37 }
 0x296   :  { %v568_v49 = vor.u32 1.1754944e-38, %v567_v41  ;;  %vm566_vm11 = vcmp.eq.f32.partialorder %v565_v43, 8.507059e+37 }
 0x299   :  { %v1316_v7 = vpop.eup %1315 }
 0x29a   :  { %v1318_v8 = vpop.eup %1317  ;;  %v534_v9 = vmul.f32 %v1316_v7, %v532_v5  ;;  %vm539_vm4 = vweird.f32 %v1316_v7 }
 0x29b   :  { %v557_v13 = vmul.f32 %v1318_v8, %v555_v6  ;;  %vm540_vm6 = vmor %vm538_vm5, %vm539_vm4  ;;  %vm562_vm8 = vweird.f32 %v1318_v8 }
 0x29c   :  { %v535_v15 = vsub.f32 1.0, %v534_v9  ;;  %vm563_vm10 = vmor %vm561_vm9, %vm562_vm8 }
 0x29d   :  { %v558_v19 = vsub.f32 1.0, %v557_v13 }
 0x29e   :  { %v536_v29 = vmul.f32 %v1316_v7, %v535_v15 }
 0x29f   :  { %v559_v31 = vmul.f32 %v1318_v8, %v558_v19 }
 0x2a0   :  { %v537_v32 = vadd.f32 %v1316_v7, %v536_v29 }
 0x2a1   :  { %v560_v39 = vadd.f32 %v1318_v8, %v559_v31 }
 0x2a2   :  { %v541_v35 = vsel %vm540_vm6, %v1316_v7, %v537_v32 }
 0x2a3   :  { %v546_v38 = vsel %vm543_vm7, %v545_v33, %v541_v35  ;;  %v564_v48 = vsel %vm563_vm10, %v1318_v8, %v560_v39 }
 0x2a4   :  { %v574_v40 = vmul.f32 %v572_v34, %v546_v38  ;;  %v569_v51 = vsel %vm566_vm11, %v568_v49, %v564_v48 }
 0x2a5   :  { %v577_v44 = vsub.f32 1.0, %v569_v51  ;;  %v581_v58 = vmul.f32 %v579_v54, %v569_v51 }
 0x2a6   :  { %v575_v46 = vadd.f32 %v574_v40, %v1644_v17 }
 0x2a8   :  { %1319 = vtanh.f32 %v575_v46 }
 0x2ae   :  { %v1320_v56 = vpop.eup %1319 }
 0x2af   :  { %v578_v57 = vmul.f32 %v1320_v56, %v577_v44 }
 0x2b1   :  { %v1701_v59 = vadd.f32 %v581_v58, %v578_v57 }
 0x2b3   :  { %v584_v60 = vrot.slane %v1701_v59, 4  ;;  %v701_v57 = vrot.slane %v1701_v59, 6 }
 0x2b5   :  { %1254 = vmatmul.msk.f32.vlgmr.msrb.gmra.mxu1 %vm133_vm2, %v584_v60  ;;  %1255 = vmatmul.msk.f32.vlgmr.msrb.gmra.mxu2 %vm133_vm2, %v584_v60 }
 0x2b6   :  { %1256 = vmatmul.msk.f32.vlgmr.msrb.gmra.mxu3 %vm133_vm2, %v584_v60  ;;  %872 = vmatpush.msrb.mxu1 %v1563_v24 }
 0x2b7   :  { %954 = vmatpush.msrb.mxu2 %v1532_v2  ;;  %974 = vmatpush.msrb.mxu3 %v1547_v20 }
 0x2b8   :  { %873 = vmatpush.msrb.mxu1 %v1571_v25 }
 0x2b9   :  { %955 = vmatpush.msrb.mxu2 %v1538_v10  ;;  %975 = vmatpush.msrb.mxu3 %v1554_v21 }
 0x2ba   :  { %874 = vmatpush.msrb.mxu1 %v1573_v26 }
 0x2bb   :  { %956 = vmatpush.msrb.mxu2 %v1541_v14  ;;  %976 = vmatpush.msrb.mxu3 %v1559_v22 }
 0x2bc   :  { %875 = vmatpush.msrb.mxu1 %v1577_v27 }
 0x2bd   :  { %957 = vmatpush.msrb.mxu2 %v1544_v18  ;;  %977 = vmatpush.msrb.mxu3 %v1561_v23 }
 0x332   :  { %v604_v52 = vpop.f32.mrf.mxu1 }
 0x333   :  { %v605_v61 = vadd.f32 %v604_v52, %v1620_v37 }
 0x335   :  { %v648_v62 = vrot.slane %v605_v61, 2 }
 0x337   :  { %v650_v63 = vadd.f32 %v648_v62, %v1624_v42 }
 0x338   :  { %v624_v1 = vpop.f32.mrf.mxu2 }
 0x339   :  { %v1257_v3 = vmul.f32 -1.442695, %v650_v63  ;;  %v625_v4 = vadd.f32 %v624_v1, %v1630_v50  ;;  %v644_v19 = vpop.f32.mrf.mxu3 }
 0x33a   :  { %v645_v29 = vadd.f32 %v644_v19, %v1638_v0 }
 0x33b   :  { %1321 = vpow2.f32 %v1257_v3  ;;  %v671_v5 = vrot.slane %v625_v4, 2 }
 0x33c   :  { %v694_v39 = vrot.slane %v645_v29, 2 }
 0x33d   :  { %v673_v6 = vadd.f32 %v671_v5, %v1634_v55 }
 0x33f   :  { %v1258_v7 = vmul.f32 -1.442695, %v673_v6 }
 0x341   :  { %v1322_v8 = vpop.eup %1321  ;;  %1323 = vpow2.f32 %v1258_v7 }
 0x342   :  { %v654_v9 = vadd.f32 1.0, %v1322_v8 }
 0x344   :  { %1325 = vrcp.f32 %v654_v9  ;;  %v666_v28 = vand.u32 2147483648, %v654_v9  ;;  %v664_v31 = vand.u32 2147483647, %v654_v9  ;;  %vm660_vm13 = vweird.f32 %v654_v9 }
 0x346   :  { %v667_v34 = vor.u32 1.1754944e-38, %v666_v28  ;;  %vm665_vm15 = vcmp.eq.f32.partialorder %v664_v31, 8.507059e+37 }
 0x347   :  { %v1324_v11 = vpop.eup %1323 }
 0x348   :  { %v677_v13 = vadd.f32 1.0, %v1324_v11 }
 0x34a   :  { %v1326_v15 = vpop.eup %1325  ;;  %1327 = vrcp.f32 %v677_v13  ;;  %v689_v43 = vand.u32 2147483648, %v677_v13  ;;  %v687_v48 = vand.u32 2147483647, %v677_v13  ;;  %vm683_vm1 = vweird.f32 %v677_v13 }
 0x34b   :  { %v656_v16 = vmul.f32 %v1326_v15, %v654_v9  ;;  %vm661_vm12 = vweird.f32 %v1326_v15 }
 0x34c   :  { %vm662_vm14 = vmor %vm660_vm13, %vm661_vm12  ;;  %v690_v54 = vor.u32 1.1754944e-38, %v689_v43  ;;  %vm688_vm4 = vcmp.eq.f32.partialorder %v687_v48, 8.507059e+37 }
 0x34d   :  { %v657_v42 = vsub.f32 1.0, %v656_v16 }
 0x34f   :  { %v658_v30 = vmul.f32 %v1326_v15, %v657_v42 }
 0x350   :  { %v1328_v32 = vpop.eup %1327 }
 0x351   :  { %v679_v55 = vmul.f32 %v1328_v32, %v677_v13  ;;  %v659_v33 = vadd.f32 %v1326_v15, %v658_v30  ;;  %vm684_vm0 = vweird.f32 %v1328_v32 }
 0x352   :  { %vm685_vm3 = vmor %vm683_vm1, %vm684_vm0 }
 0x353   :  { %v680_v35 = vsub.f32 1.0, %v679_v55  ;;  %v663_v38 = vsel %vm662_vm14, %v1326_v15, %v659_v33  ;;  %v1754_v55 = vadd.f32 %v1667_v45, %v129_v12 }
 0x354   :  { %v668_v40 = vsel %vm665_vm15, %v667_v34, %v663_v38 }
 0x355   :  { %v681_v41 = vmul.f32 %v1328_v32, %v680_v35  ;;  %v696_v46 = vmul.f32 %v694_v39, %v668_v40 }
 0x357   :  { %v682_v49 = vadd.f32 %v1328_v32, %v681_v41  ;;  %v697_v51 = vadd.f32 %v696_v46, %v1644_v17 }
 0x359   :  { %v686_v44 = vsel %vm685_vm3, %v1328_v32, %v682_v49  ;;  %1329 = vtanh.f32 %v697_v51 }
 0x35a   :  { %v691_v56 = vsel %vm688_vm4, %v690_v54, %v686_v44 }
 0x35b   :  { %v699_v58 = vsub.f32 1.0, %v691_v56  ;;  %v703_v61 = vmul.f32 %v701_v57, %v691_v56 }
 0x35f   :  { %v1330_v60 = vpop.eup %1329 }
 0x360   :  { %v700_v52 = vmul.f32 %v1330_v60, %v699_v58 }
 0x362   :  { %v704_v62 = vadd.f32 %v703_v61, %v700_v52 }
 0x364   :  { %v1726_v63 = vrot.slane %v704_v62, 6 }
 0x366   :  { %1259 = vmatmul.msk.f32.vlgmr.msra.gmra.mxu0 %vm133_vm2, %v1726_v63  ;;  %1260 = vmatmul.msk.f32.vlgmr.msra.gmra.mxu1 %vm133_vm2, %v1726_v63 }
 0x367   :  { %1261 = vmatmul.msk.f32.vlgmr.msra.gmra.mxu2 %vm133_vm2, %v1726_v63  ;;  %994 = vmatpush.msra.mxu0 %v1563_v24 }
 0x368   :  { %1076 = vmatpush.msra.mxu1 %v1532_v2  ;;  %1096 = vmatpush.msra.mxu2 %v1547_v20 }
 0x369   :  { %995 = vmatpush.msra.mxu0 %v1571_v25 }
 0x36a   :  { %1077 = vmatpush.msra.mxu1 %v1538_v10  ;;  %1097 = vmatpush.msra.mxu2 %v1554_v21 }
 0x36b   :  { %996 = vmatpush.msra.mxu0 %v1573_v26 }
 0x36c   :  { %1078 = vmatpush.msra.mxu1 %v1541_v14  ;;  %1098 = vmatpush.msra.mxu2 %v1559_v22 }
 0x36d   :  { %997 = vmatpush.msra.mxu0 %v1577_v27 }
 0x36e   :  { %1079 = vmatpush.msra.mxu1 %v1544_v18  ;;  %1099 = vmatpush.msra.mxu2 %v1561_v23 }
 0x3e3   :  { %v726_v2 = vpop.f32.mrf.mxu0  ;;  %v746_v20 = vpop.f32.mrf.mxu1 }
 0x3e4   :  { %v727_v17 = vadd.f32 %v726_v2, %v1620_v37  ;;  %v747_v10 = vadd.f32 %v746_v20, %v1630_v50 }
 0x3e6   :  { %v769_v21 = vadd.f32 %v727_v17, %v1627_v47  ;;  %v789_v59 = vadd.f32 %v747_v10, %v1632_v53 }
 0x3e8   :  { %v1262_v1 = vmul.f32 -1.442695, %v769_v21  ;;  %v1263_v14 = vmul.f32 -1.442695, %v789_v59 }
 0x3ea   :  { %1331 = vpow2.f32 %v1262_v1  ;;  %v766_v19 = vpop.f32.mrf.mxu2 }
 0x3eb   :  { %1333 = vpow2.f32 %v1263_v14  ;;  %v767_v29 = vadd.f32 %v766_v19, %v1638_v0 }
 0x3f0   :  { %v1332_v22 = vpop.eup %1331 }
 0x3f1   :  { %v1334_v3 = vpop.eup %1333  ;;  %v773_v4 = vadd.f32 1.0, %v1332_v22 }
 0x3f2   :  { %v793_v18 = vadd.f32 1.0, %v1334_v3 }
 0x3f3   :  { %1335 = vrcp.f32 %v773_v4  ;;  %v785_v11 = vand.u32 2147483648, %v773_v4  ;;  %v783_v15 = vand.u32 2147483647, %v773_v4  ;;  %vm779_vm6 = vweird.f32 %v773_v4 }
 0x3f4   :  { %1337 = vrcp.f32 %v793_v18  ;;  %v805_v33 = vand.u32 2147483648, %v793_v18  ;;  %vm799_vm10 = vweird.f32 %v793_v18  ;;  %v803_v35 = vand.u32 2147483647, %v793_v18 }
 0x3f5   :  { %v786_v28 = vor.u32 1.1754944e-38, %v785_v11  ;;  %vm784_vm8 = vcmp.eq.f32.partialorder %v783_v15, 8.507059e+37 }
 0x3f6   :  { %v806_v40 = vor.u32 1.1754944e-38, %v805_v33  ;;  %vm804_vm12 = vcmp.eq.f32.partialorder %v803_v35, 8.507059e+37 }
 0x3f9   :  { %v1336_v23 = vpop.eup %1335 }
 0x3fa   :  { %v1338_v5 = vpop.eup %1337  ;;  %v775_v6 = vmul.f32 %v1336_v23, %v773_v4  ;;  %vm780_vm5 = vweird.f32 %v1336_v23 }
 0x3fb   :  { %v795_v7 = vmul.f32 %v1338_v5, %v793_v18  ;;  %vm781_vm7 = vmor %vm779_vm6, %vm780_vm5  ;;  %vm800_vm9 = vweird.f32 %v1338_v5 }
 0x3fc   :  { %v776_v8 = vsub.f32 1.0, %v775_v6  ;;  %vm801_vm11 = vmor %vm799_vm10, %vm800_vm9 }
 0x3fd   :  { %v796_v9 = vsub.f32 1.0, %v795_v7 }
 0x3fe   :  { %v777_v13 = vmul.f32 %v1336_v23, %v776_v8 }
 0x3ff   :  { %v797_v16 = vmul.f32 %v1338_v5, %v796_v9 }
 0x400   :  { %v778_v42 = vadd.f32 %v1336_v23, %v777_v13 }
 0x401   :  { %v798_v32 = vadd.f32 %v1338_v5, %v797_v16 }
 0x402   :  { %v782_v30 = vsel %vm781_vm7, %v1336_v23, %v778_v42 }
 0x403   :  { %v787_v31 = vsel %vm784_vm8, %v786_v28, %v782_v30  ;;  %v802_v39 = vsel %vm801_vm11, %v1338_v5, %v798_v32 }
 0x404   :  { %v809_v34 = vmul.f32 %v787_v31, %v767_v29  ;;  %v807_v41 = vsel %vm804_vm12, %v806_v40, %v802_v39 }
 0x405   :  { %v812_v43 = vsub.f32 1.0, %v807_v41  ;;  %v815_v36 = vmul.f32 %v807_v41, %v1726_v63 }
 0x406   :  { %v810_v38 = vadd.f32 %v809_v34, %v1754_v55 }
 0x408   :  { %1339 = vtanh.f32 %v810_v38 }
 0x40e   :  { %v1340_v46 = vpop.eup %1339 }
 0x40f   :  { %v813_v48 = vmul.f32 %v1340_v46, %v812_v43 }
 0x411   :  { %v1758_v49 = vadd.f32 %v815_v36, %v813_v48 }
 0x413   :  { %1264 = vmatmul.msk.f32.vlgmr.msra.gmra.mxu3 %vm133_vm2, %v1758_v49  ;;  %1265 = vmatmul.msk.f32.vlgmr.msrb.gmra.mxu0 %vm133_vm2, %v1758_v49  ;;  %v934_v42 = vrot.slane %v1758_v49, 6 }
 0x414   :  { %1266 = vmatmul.msk.f32.vlgmr.msrb.gmra.mxu1 %vm133_vm2, %v1758_v49  ;;  %1116 = vmatpush.msra.mxu3 %v1563_v24 }
 0x416   :  { %1117 = vmatpush.msra.mxu3 %v1571_v25 }
 0x418   :  { %1118 = vmatpush.msra.mxu3 %v1573_v26 }
 0x41a   :  { %1119 = vmatpush.msra.mxu3 %v1577_v27 }
 0x490   :  { %v857_v12 = vpop.f32.mrf.mxu0 }
 0x491   :  { %v858_v45 = vadd.f32 %v857_v12, %v1630_v50  ;;  %v877_v17 = vpop.f32.mrf.mxu1 }
 0x492   :  { %v878_v59 = vadd.f32 %v877_v17, %v1638_v0 }
 0x493   :  { %v904_v51 = vrot.slane %v858_v45, 6 }
 0x494   :  { %v927_v18 = vrot.slane %v878_v59, 6 }
 0x495   :  { %v906_v54 = vadd.f32 %v904_v51, %v1632_v53 }
 0x496   :  { %v837_v44 = vpop.f32.mrf.mxu3 }
 0x497   :  { %v1268_v56 = vmul.f32 -1.442695, %v906_v54  ;;  %v838_v57 = vadd.f32 %v837_v44, %v1620_v37 }
 0x499   :  { %1341 = vpow2.f32 %v1268_v56  ;;  %v881_v58 = vrot.slane %v838_v57, 6 }
 0x49b   :  { %v883_v24 = vadd.f32 %v881_v58, %v1627_v47 }
 0x49d   :  { %v1267_v60 = vmul.f32 -1.442695, %v883_v24 }
 0x49f   :  { %v1342_v25 = vpop.eup %1341  ;;  %1343 = vpow2.f32 %v1267_v60 }
 0x4a0   :  { %v910_v26 = vadd.f32 1.0, %v1342_v25 }
 0x4a2   :  { %1345 = vrcp.f32 %v910_v26  ;;  %v922_v7 = vand.u32 2147483648, %v910_v26  ;;  %vm916_vm3 = vweird.f32 %v910_v26  ;;  %v920_v9 = vand.u32 2147483647, %v910_v26 }
 0x4a4   :  { %v923_v15 = vor.u32 1.1754944e-38, %v922_v7  ;;  %vm921_vm5 = vcmp.eq.f32.partialorder %v920_v9, 8.507059e+37 }
 0x4a5   :  { %v1344_v27 = vpop.eup %1343 }
 0x4a6   :  { %v887_v52 = vadd.f32 1.0, %v1344_v27 }
 0x4a8   :  { %1347 = vrcp.f32 %v887_v52  ;;  %v1346_v61 = vpop.eup %1345  ;;  %v899_v21 = vand.u32 2147483648, %v887_v52  ;;  %v897_v14 = vand.u32 2147483647, %v887_v52  ;;  %vm893_vm14 = vweird.f32 %v887_v52 }
 0x4a9   :  { %v912_v62 = vmul.f32 %v1346_v61, %v910_v26  ;;  %vm917_vm1 = vweird.f32 %v1346_v61 }
 0x4aa   :  { %v900_v4 = vor.u32 1.1754944e-38, %v899_v21  ;;  %vm898_vm0 = vcmp.eq.f32.partialorder %v897_v14, 8.507059e+37  ;;  %vm918_vm4 = vmor %vm916_vm3, %vm917_vm1 }
 0x4ab   :  { %v913_v20 = vsub.f32 1.0, %v912_v62 }
 0x4ad   :  { %v914_v22 = vmul.f32 %v1346_v61, %v913_v20 }
 0x4ae   :  { %v1348_v63 = vpop.eup %1347 }
 0x4af   :  { %v889_v2 = vmul.f32 %v1348_v63, %v887_v52  ;;  %vm894_vm13 = vweird.f32 %v1348_v63  ;;  %v915_v5 = vadd.f32 %v1346_v61, %v914_v22 }
 0x4b0   :  { %vm895_vm15 = vmor %vm893_vm14, %vm894_vm13 }
 0x4b1   :  { %v890_v10 = vsub.f32 1.0, %v889_v2  ;;  %v919_v13 = vsel %vm918_vm4, %v1346_v61, %v915_v5 }
 0x4b2   :  { %v924_v16 = vsel %vm921_vm5, %v923_v15, %v919_v13 }
 0x4b3   :  { %v891_v1 = vmul.f32 %v1348_v63, %v890_v10  ;;  %v932_v19 = vsub.f32 1.0, %v924_v16  ;;  %v936_v30 = vmul.f32 %v934_v42, %v924_v16 }
 0x4b5   :  { %v892_v3 = vadd.f32 %v1348_v63, %v891_v1 }
 0x4b7   :  { %v896_v23 = vsel %vm895_vm15, %v1348_v63, %v892_v3 }
 0x4b8   :  { %v901_v6 = vsel %vm898_vm0, %v900_v4, %v896_v23 }
 0x4b9   :  { %v929_v8 = vmul.f32 %v927_v18, %v901_v6 }
 0x4bb   :  { %v930_v11 = vadd.f32 %v929_v8, %v1754_v55 }
 0x4bd   :  { %1349 = vtanh.f32 %v930_v11 }
 0x4c3   :  { %v1350_v28 = vpop.eup %1349 }
 0x4c4   :  { %v933_v29 = vmul.f32 %v1350_v28, %v932_v19 }
 0x4c6   :  { %v937_v31 = vadd.f32 %v936_v30, %v933_v29 }
 0x4c8   :  { %v939_v32 = vrot.slane %v937_v31, 2  ;;  %v1056_v4 = vrot.slane %v937_v31, 6  ;;  %v1185_v31 = vld [vmem:[#allocation7 + $0x18] sm:$0xff] }
 0x4c9   :  { %1204 = vmatpush.msrb.mxu0 %v1185_v31 }
 0x4ca   :  { %1269 = vmatmul.msk.f32.vlgmr.msrb.gmra.mxu2 %vm133_vm2, %v939_v32  ;;  %1270 = vmatmul.msk.f32.vlgmr.msrb.gmra.mxu3 %vm133_vm2, %v939_v32 }
 0x4cb   :  { %1271 = vmatmul.msk.f32.vlgmr.msra.gmra.mxu0 %vm133_vm2, %v939_v32  ;;  %v1184_v32 = vld [vmem:[#allocation7 + $0x10] sm:$0xff] }
 0x4cc   :  { %1205 = vmatpush.msrb.mxu0 %v1184_v32 }
 0x548   :  { %v999_v56 = vpop.f32.mrf.mxu0 }
 0x549   :  { %v1000_v25 = vadd.f32 %v999_v56, %v1638_v0 }
 0x54b   :  { %v1049_v63 = vrot.slane %v1000_v25, 4 }
 0x54d   :  { %v959_v33 = vpop.f32.mrf.mxu2  ;;  %v979_v34 = vpop.f32.mrf.mxu3 }
 0x54e   :  { %v960_v35 = vadd.f32 %v959_v33, %v1620_v37  ;;  %v980_v38 = vadd.f32 %v979_v34, %v1630_v50  ;;  %v1183_v34 = vld [vmem:[#allocation7 + $0x8] sm:$0xff] }
 0x54f   :  { %1206 = vmatpush.msrb.mxu0 %v1183_v34 }
 0x550   :  { %v1003_v39 = vrot.slane %v960_v35, 4  ;;  %v1026_v40 = vrot.slane %v980_v38, 4 }
 0x552   :  { %v1005_v41 = vadd.f32 %v1003_v39, %v1627_v47  ;;  %v1028_v43 = vadd.f32 %v1026_v40, %v1632_v53 }
 0x554   :  { %v1272_v46 = vmul.f32 -1.442695, %v1005_v41  ;;  %v1273_v48 = vmul.f32 -1.442695, %v1028_v43 }
 0x556   :  { %1351 = vpow2.f32 %v1272_v46 }
 0x557   :  { %1353 = vpow2.f32 %v1273_v48 }
 0x55c   :  { %v1352_v36 = vpop.eup %1351 }
 0x55d   :  { %v1354_v49 = vpop.eup %1353  ;;  %v1009_v12 = vadd.f32 1.0, %v1352_v36 }
 0x55e   :  { %v1032_v45 = vadd.f32 1.0, %v1354_v49 }
 0x55f   :  { %1355 = vrcp.f32 %v1009_v12  ;;  %v1021_v24 = vand.u32 2147483648, %v1009_v12  ;;  %v1019_v27 = vand.u32 2147483647, %v1009_v12  ;;  %vm1015_vm7 = vweird.f32 %v1009_v12 }
 0x560   :  { %1357 = vrcp.f32 %v1032_v45  ;;  %v1044_v21 = vand.u32 2147483648, %v1032_v45  ;;  %vm1038_vm11 = vweird.f32 %v1032_v45  ;;  %v1042_v59 = vand.u32 2147483647, %v1032_v45 }
 0x561   :  { %v1022_v62 = vor.u32 1.1754944e-38, %v1021_v24  ;;  %vm1020_vm9 = vcmp.eq.f32.partialorder %v1019_v27, 8.507059e+37 }
 0x562   :  { %v1045_v22 = vor.u32 1.1754944e-38, %v1044_v21  ;;  %vm1043_vm13 = vcmp.eq.f32.partialorder %v1042_v59, 8.507059e+37 }
 0x565   :  { %v1356_v51 = vpop.eup %1355 }
 0x566   :  { %v1358_v54 = vpop.eup %1357  ;;  %v1011_v44 = vmul.f32 %v1356_v51, %v1009_v12  ;;  %vm1016_vm6 = vweird.f32 %v1356_v51 }
 0x567   :  { %v1034_v57 = vmul.f32 %v1358_v54, %v1032_v45  ;;  %vm1017_vm8 = vmor %vm1015_vm7, %vm1016_vm6  ;;  %vm1039_vm10 = vweird.f32 %v1358_v54 }
 0x568   :  { %v1012_v58 = vsub.f32 1.0, %v1011_v44  ;;  %vm1040_vm12 = vmor %vm1038_vm11, %vm1039_vm10 }
 0x569   :  { %v1035_v60 = vsub.f32 1.0, %v1034_v57 }
 0x56a   :  { %v1013_v26 = vmul.f32 %v1356_v51, %v1012_v58 }
 0x56b   :  { %v1036_v52 = vmul.f32 %v1358_v54, %v1035_v60 }
 0x56c   :  { %v1014_v61 = vadd.f32 %v1356_v51, %v1013_v26 }
 0x56d   :  { %v1037_v17 = vadd.f32 %v1358_v54, %v1036_v52 }
 0x56e   :  { %v1018_v2 = vsel %vm1017_vm8, %v1356_v51, %v1014_v61 }
 0x56f   :  { %v1023_v20 = vsel %vm1020_vm9, %v1022_v62, %v1018_v2  ;;  %v1041_v14 = vsel %vm1040_vm12, %v1358_v54, %v1037_v17 }
 0x570   :  { %v1051_v10 = vmul.f32 %v1049_v63, %v1023_v20  ;;  %v1046_v3 = vsel %vm1043_vm13, %v1045_v22, %v1041_v14 }
 0x571   :  { %v1054_v18 = vsub.f32 1.0, %v1046_v3  ;;  %v1058_v6 = vmul.f32 %v1056_v4, %v1046_v3 }
 0x572   :  { %v1052_v1 = vadd.f32 %v1051_v10, %v1754_v55 }
 0x574   :  { %1359 = vtanh.f32 %v1052_v1 }
 0x57a   :  { %v1360_v23 = vpop.eup %1359 }
 0x57b   :  { %v1055_v5 = vmul.f32 %v1360_v23, %v1054_v18 }
 0x57d   :  { %v1786_v7 = vadd.f32 %v1058_v6, %v1055_v5 }
 0x57f   :  { %v1061_v8 = vrot.slane %v1786_v7, 4  ;;  %v1178_v61 = vrot.slane %v1786_v7, 6 }
 0x581   :  { %1274 = vmatmul.msk.f32.vlgmr.msra.gmra.mxu1 %vm133_vm2, %v1061_v8  ;;  %1275 = vmatmul.msk.f32.vlgmr.msra.gmra.mxu2 %vm133_vm2, %v1061_v8 }
 0x582   :  { %1276 = vmatmul.msk.f32.vlgmr.msra.gmra.mxu3 %vm133_vm2, %v1061_v8 }
 0x5fe   :  { %v1081_v9 = vpop.f32.mrf.mxu1 }
 0x5ff   :  { %v1082_v11 = vadd.f32 %v1081_v9, %v1620_v37  ;;  %v1182_v37 = vld [vmem:[#allocation7] sm:$0xff] }
 0x600   :  { %1207 = vmatpush.msrb.mxu0 %v1182_v37 }
 0x601   :  { %v1125_v13 = vrot.slane %v1082_v11, 2 }
 0x603   :  { %v1127_v15 = vadd.f32 %v1125_v13, %v1627_v47 }
 0x604   :  { %v1101_v16 = vpop.f32.mrf.mxu2 }
 0x605   :  { %v1277_v19 = vmul.f32 -1.442695, %v1127_v15  ;;  %v1102_v42 = vadd.f32 %v1101_v16, %v1630_v50  ;;  %v1121_v40 = vpop.f32.mrf.mxu3 }
 0x606   :  { %v1122_v43 = vadd.f32 %v1121_v40, %v1638_v0 }
 0x607   :  { %1361 = vpow2.f32 %v1277_v19  ;;  %v1148_v28 = vrot.slane %v1102_v42, 2 }
 0x608   :  { %v1171_v44 = vrot.slane %v1122_v43, 2 }
 0x609   :  { %v1150_v29 = vadd.f32 %v1148_v28, %v1632_v53 }
 0x60b   :  { %v1278_v30 = vmul.f32 -1.442695, %v1150_v29 }
 0x60d   :  { %v1362_v33 = vpop.eup %1361  ;;  %1363 = vpow2.f32 %v1278_v30 }
 0x60e   :  { %v1131_v35 = vadd.f32 1.0, %v1362_v33 }
 0x610   :  { %1365 = vrcp.f32 %v1131_v35  ;;  %v1143_v41 = vand.u32 2147483648, %v1131_v35  ;;  %v1141_v48 = vand.u32 2147483647, %v1131_v35  ;;  %vm1137_vm15 = vweird.f32 %v1131_v35 }
 0x612   :  { %v1144_v45 = vor.u32 1.1754944e-38, %v1143_v41  ;;  %vm1142_vm1 = vcmp.eq.f32.partialorder %v1141_v48, 8.507059e+37 }
 0x613   :  { %v1364_v47 = vpop.eup %1363 }
 0x614   :  { %v1154_v38 = vadd.f32 1.0, %v1364_v47 }
 0x616   :  { %v1366_v50 = vpop.eup %1365  ;;  %1367 = vrcp.f32 %v1154_v38  ;;  %v1166_v58 = vand.u32 2147483648, %v1154_v38  ;;  %v1164_v60 = vand.u32 2147483647, %v1154_v38  ;;  %vm1160_vm4 = vweird.f32 %v1154_v38 }
 0x617   :  { %v1133_v39 = vmul.f32 %v1366_v50, %v1131_v35  ;;  %vm1138_vm14 = vweird.f32 %v1366_v50 }
 0x618   :  { %vm1139_vm0 = vmor %vm1137_vm15, %vm1138_vm14  ;;  %v1167_v26 = vor.u32 1.1754944e-38, %v1166_v58  ;;  %vm1165_vm6 = vcmp.eq.f32.partialorder %v1164_v60, 8.507059e+37 }
 0x619   :  { %v1134_v53 = vsub.f32 1.0, %v1133_v39 }
 0x61b   :  { %v1135_v46 = vmul.f32 %v1366_v50, %v1134_v53 }
 0x61c   :  { %v1368_v36 = vpop.eup %1367 }
 0x61d   :  { %v1156_v49 = vmul.f32 %v1368_v36, %v1154_v38  ;;  %v1136_v12 = vadd.f32 %v1366_v50, %v1135_v46  ;;  %vm1161_vm3 = vweird.f32 %v1368_v36 }
 0x61e   :  { %vm1162_vm5 = vmor %vm1160_vm4, %vm1161_vm3 }
 0x61f   :  { %v1157_v51 = vsub.f32 1.0, %v1156_v49  ;;  %v1140_v54 = vsel %vm1139_vm0, %v1366_v50, %v1136_v12 }
 0x620   :  { %v1145_v56 = vsel %vm1142_vm1, %v1144_v45, %v1140_v54 }
 0x621   :  { %v1158_v57 = vmul.f32 %v1368_v36, %v1157_v51  ;;  %v1173_v24 = vmul.f32 %v1171_v44, %v1145_v56 }
 0x623   :  { %v1159_v0 = vadd.f32 %v1368_v36, %v1158_v57  ;;  %v1174_v25 = vadd.f32 %v1173_v24, %v1754_v55  ;;  %v1290_v55 = vld [vmem:[%s1811_s5 + $0x3] ss:$0 sm:$0xff] }
 0x625   :  { %v1163_v27 = vsel %vm1162_vm5, %v1368_v36, %v1159_v0  ;;  %1369 = vtanh.f32 %v1174_v25 }
 0x626   :  { %v1168_v52 = vsel %vm1165_vm6, %v1167_v26, %v1163_v27 }
 0x627   :  { %v1176_v62 = vsub.f32 1.0, %v1168_v52  ;;  %v1180_v20 = vmul.f32 %v1178_v61, %v1168_v52 }
 0x62b   :  { %v1370_v63 = vpop.eup %1369 }
 0x62c   :  { %v1177_v2 = vmul.f32 %v1370_v63, %v1176_v62 }
 0x62e   :  { %v1181_v17 = vadd.f32 %v1180_v20, %v1177_v2 }
 0x630   :  { %v1189_v10 = vrot.slane %v1181_v17, 6 }
 0x632   :  { %1279 = vmatmul.msk.f32.vlgmr.msrb.gmra.mxu0 %vm133_vm2, %v1189_v10 }
 0x6af   :  { %v1209_v21 = vpop.f32.mrf.mxu0 }
 0x6b0   :  { %v1210_v59 = vadd.f32 %v1290_v55, %v1209_v21 }
 0x6b2   :  { %1212 = vst [vmem:[#allocation8] sm:$0x3] %v1210_v59 }
 0x6b3   :  { %1223 = dma.vmem_to_hbm [thread:$0]  %s1219_s26, 32, %s1221_s29, [#allocation4]  }
 0x6b4   :  { %1471 = dma.done.wait [#allocation4], 32  }
 0x6b5   :  { %1472 = vsyncadd [#allocation4], 4294967264 }
 0x6b6   :  { %1228 = vsyncpa [#allocation3], 1 }
 0x6b7   :  { %1229 = vsyncpa [#allocation6], 1 }
 0x6b8   :  { %1230 = vsyncpa [#allocation4], 1 }

</bundles_post_ra>
